<compile_context>
chip_gen: v7x
topology: tpu7x:2x2x1
jax: 0.10.0
libtpu: 0.0.40
codegen_flags: <defaults>
</compile_context>

<pallas_src>
import jax
import jax.numpy as jnp
from jax.experimental import pallas as pl
from jax.experimental.pallas import tpu as pltpu

EPS = 1e-5


def _mlp_kernel(h_ref, w1_ref, w234_ref, b_ref, w5_ref, b5_ref, o_ref):
    # biases (4, 512) f32, VMEM-resident across the whole grid
    b = b_ref[...]

    # Layer 1: (TB, 256) @ (256, 512), bf16 operands, f32 accumulation
    x = h_ref[...].astype(jnp.bfloat16)
    y = jnp.dot(x, w1_ref[...], preferred_element_type=jnp.float32)
    y = jnp.maximum(y + b[0:1, :], 0.0)

    # Layers 2-4: (TB, 512) @ (512, 512)
    for i in range(3):
        y = jnp.dot(y.astype(jnp.bfloat16), w234_ref[i],
                    preferred_element_type=jnp.float32)
        y = jnp.maximum(y + b[i + 1:i + 2, :], 0.0)

    # Final Linear(512, 1): VPU multiply + lane reduction (skips a degenerate
    # N=1 MXU matmul and the lane-padded (512,1) weight tile).
    w5 = w5_ref[...].astype(jnp.float32)                       # (1, 512)
    o_ref[...] = jnp.sum(y * w5, axis=-1, keepdims=True) + b5_ref[0, 0]


def _choose_tb(B):
    """Batch tile size.

    - Large tiles amortize per-grid-step overhead (~0.35 us/step).
    - For B >= 256 always keep >= 2 grid steps so dimension_semantics
      ("parallel",) can shard the batch axis across both v7x TensorCores.
    - For small B, one 8-row-aligned tile covering the whole batch.
    """
    if B < 256:
        return max(8, ((B + 7) // 8) * 8)
    for tb in (1024, 512, 256, 128):
        if B >= 2 * tb:
            return tb
    return 128


def u2s_domain_classifier(h, packed):
    """h: (B, 256) float32. packed: output of _fold_and_pack()."""
    w1, w234, b_stack, w5, b5 = packed
    B = h.shape[0]
    TB = _choose_tb(B)
    grid = (pl.cdiv(B, TB),)   # ragged last block handled by Pallas

    # Grid-invariant operands: constant index_map + a single VMEM buffer.
    resident = pl.Buffered(1)

    out = pl.pallas_call(
        _mlp_kernel,
        out_shape=jax.ShapeDtypeStruct((B, 1), jnp.float32),
        grid=grid,
        in_specs=[
            pl.BlockSpec((TB, 256), lambda i: (i, 0)),          # activations
            pl.BlockSpec(w1.shape, lambda i: (0, 0),
                         pipeline_mode=resident),               # (256,512) bf16
            pl.BlockSpec(w234.shape, lambda i: (0, 0, 0),
                         pipeline_mode=resident),               # (3,512,512) bf16
            pl.BlockSpec(b_stack.shape, lambda i: (0, 0),
                         pipeline_mode=resident),               # (4,512) f32
            pl.BlockSpec(w5.shape, lambda i: (0, 0),
                         pipeline_mode=resident),               # (1,512) bf16
            pl.BlockSpec(memory_space=pltpu.MemorySpace.SMEM),  # (1,1) f32 scalar
        ],
        out_specs=pl.BlockSpec((TB, 1), lambda i: (i, 0)),
        compiler_params=pltpu.CompilerParams(
            dimension_semantics=("parallel",),
            vmem_limit_bytes=32 << 20,
        ),
    )(h, w1, w234, b_stack, w5, b5)

    return out


def _init_raw_params(key):
    """Synthetic PyTorch-style parameters: per-layer W (in,out), b (out,),
    and eval-mode BatchNorm (gamma, beta, running_mean, running_var)."""
    dims = [(256, 512), (512, 512), (512, 512), (512, 512), (512, 1)]
    keys = iter(jax.random.split(key, 32))
    ws, bs, bns = [], [], []
    for li, (din, dout) in enumerate(dims):
        ws.append(jax.random.normal(next(keys), (din, dout), jnp.float32) * 0.05)
        bs.append(jax.random.normal(next(keys), (dout,), jnp.float32) * 0.05)
        if li < 4:
            gamma = 1.0 + 0.1 * jax.random.normal(next(keys), (dout,), jnp.float32)
            beta = 0.1 * jax.random.normal(next(keys), (dout,), jnp.float32)
            rmean = 0.1 * jax.random.normal(next(keys), (dout,), jnp.float32)
            rvar = 1.0 + 0.1 * jax.random.uniform(next(keys), (dout,), jnp.float32)
            bns.append((gamma, beta, rmean, rvar))
    return ws, bs, bns


def _fold_and_pack(raw):
    """Fold eval-mode BN into the Linear layers and pack into kernel arrays."""
    ws, bs, bns = raw
    fw, fb = [], []
    for li in range(5):
        w, b = ws[li], bs[li]
        if li < 4:
            gamma, beta, rmean, rvar = bns[li]
            scale = gamma / jnp.sqrt(rvar + EPS)
            shift = beta - rmean * scale
            w = w * scale[None, :]
            b = b * scale + shift
        fw.append(w)
        fb.append(b)

    w1 = fw[0].astype(jnp.bfloat16)                             # (256, 512)
    w234 = jnp.stack(fw[1:4]).astype(jnp.bfloat16)              # (3, 512, 512)
    b_stack = jnp.stack(fb[0:4]).astype(jnp.float32)            # (4, 512)
    w5 = fw[4].reshape(1, 512).astype(jnp.bfloat16)             # (1, 512) row
    b5 = fb[4].reshape(1, 1).astype(jnp.float32)                # (1, 1) -> SMEM
    return w1, w234, b_stack, w5, b5


def _reference(h, raw):
    """Pure-JAX f32 reference with the original (un-folded) module math."""
    ws, bs, bns = raw
    x = h
    for li in range(5):
        x = x @ ws[li] + bs[li]
        if li < 4:
            gamma, beta, rmean, rvar = bns[li]
            x = (x - rmean) / jnp.sqrt(rvar + EPS) * gamma + beta
            x = jnp.maximum(x, 0.0)
    return x


if __name__ == "__main__":
    key = jax.random.PRNGKey(0)
    kp, kx = jax.random.split(key)
    raw = _init_raw_params(kp)
    packed = _fold_and_pack(raw)

    B = 8
    h = jax.random.normal(kx, (B, 256), jnp.float32)

    out = jax.block_until_ready(u2s_domain_classifier(h, packed))
    ref = _reference(h, raw)

    assert out.shape == (B, 1), out.shape
    # bf16 weights/activations in the kernel -> relaxed tolerance vs. f32 ref.
    assert jnp.allclose(out, ref, atol=5e-2, rtol=5e-2), (
        float(jnp.max(jnp.abs(out - ref))), out, ref)
    print("KERNEL_OK")
</pallas_src>

<mosaic_0001>
module attributes {stable_mosaic.version = 11 : i64} {
  func.func @_mlp_kernel(%arg0: i32, %arg1: memref<8x256xf32, #tpu.memory_space<vmem>>, %arg2: memref<256x512xbf16, #tpu.memory_space<vmem>>, %arg3: memref<3x512x512xbf16, #tpu.memory_space<vmem>>, %arg4: memref<4x512xf32, #tpu.memory_space<vmem>>, %arg5: memref<1x512xbf16, #tpu.memory_space<vmem>>, %arg6: memref<1x1xf32, #tpu.memory_space<smem>>, %arg7: memref<8x1xf32, #tpu.memory_space<vmem>>) attributes {dimension_semantics = [#tpu.dimension_semantics<parallel>], iteration_bounds = array<i64: 1>, scalar_prefetch = 0 : i64, scratch_operands = 0 : i64, tpu.core_type = #tpu.core_type<tc>, window_params = [{transform_indices = @transform_0, window_bounds = array<i64: 8, 256>}, {pipeline_mode = #tpu.pipeline_mode<synchronous>, transform_indices = @transform_1, window_bounds = array<i64: 256, 512>}, {pipeline_mode = #tpu.pipeline_mode<synchronous>, transform_indices = @transform_2, window_bounds = array<i64: 3, 512, 512>}, {pipeline_mode = #tpu.pipeline_mode<synchronous>, transform_indices = @transform_3, window_bounds = array<i64: 4, 512>}, {pipeline_mode = #tpu.pipeline_mode<synchronous>, transform_indices = @transform_4, window_bounds = array<i64: 1, 512>}, {transform_indices = @transform_5, window_bounds = array<i64: 1, 1>}, {transform_indices = @transform_6, window_bounds = array<i64: 8, 1>}]} {
    %c0 = arith.constant 0 : index
    %c0_0 = arith.constant 0 : index
    %0 = vector.load %arg4[%c0, %c0_0] : memref<4x512xf32, #tpu.memory_space<vmem>>, vector<4x512xf32>
    %c0_1 = arith.constant 0 : index
    %c0_2 = arith.constant 0 : index
    %1 = vector.load %arg1[%c0_1, %c0_2] : memref<8x256xf32, #tpu.memory_space<vmem>>, vector<8x256xf32>
    %2 = arith.truncf %1 : vector<8x256xf32> to vector<8x256xbf16>
    %c0_3 = arith.constant 0 : index
    %c0_4 = arith.constant 0 : index
    %3 = vector.load %arg2[%c0_3, %c0_4] : memref<256x512xbf16, #tpu.memory_space<vmem>>, vector<256x512xbf16>
    %cst = arith.constant dense<0.000000e+00> : vector<8x512xf32>
    %4 = tpu.matmul %2, %3, %cst {dimension_numbers = #tpu.dot_dimension_numbers<[1], [0], [0], [1], [0, 0, 1, 1], [], []>} : vector<8x256xbf16>, vector<256x512xbf16>, vector<8x512xf32> -> vector<8x512xf32>
    %5 = vector.extract_strided_slice %0 {offsets = [0, 0], sizes = [1, 512], strides = [1, 1]} : vector<4x512xf32> to vector<1x512xf32>
    %6 = vector.broadcast %5 : vector<1x512xf32> to vector<8x512xf32>
    %7 = arith.addf %4, %6 : vector<8x512xf32>
    %cst_5 = arith.constant 0.000000e+00 : f32
    %8 = vector.broadcast %cst_5 : f32 to vector<8x512xf32>
    %9 = arith.maximumf %7, %8 : vector<8x512xf32>
    %10 = arith.truncf %9 : vector<8x512xf32> to vector<8x512xbf16>
    %c0_6 = arith.constant 0 : index
    %c0_7 = arith.constant 0 : index
    %c0_8 = arith.constant 0 : index
    %11 = vector.load %arg3[%c0_6, %c0_7, %c0_8] : memref<3x512x512xbf16, #tpu.memory_space<vmem>>, vector<1x512x512xbf16>
    %12 = vector.shape_cast %11 : vector<1x512x512xbf16> to vector<512x512xbf16>
    %cst_9 = arith.constant dense<0.000000e+00> : vector<8x512xf32>
    %13 = tpu.matmul %10, %12, %cst_9 {dimension_numbers = #tpu.dot_dimension_numbers<[1], [0], [0], [1], [0, 0, 1, 1], [], []>} : vector<8x512xbf16>, vector<512x512xbf16>, vector<8x512xf32> -> vector<8x512xf32>
    %14 = vector.extract_strided_slice %0 {offsets = [1, 0], sizes = [1, 512], strides = [1, 1]} : vector<4x512xf32> to vector<1x512xf32>
    %15 = vector.broadcast %14 : vector<1x512xf32> to vector<8x512xf32>
    %16 = arith.addf %13, %15 : vector<8x512xf32>
    %cst_10 = arith.constant 0.000000e+00 : f32
    %17 = vector.broadcast %cst_10 : f32 to vector<8x512xf32>
    %18 = arith.maximumf %16, %17 : vector<8x512xf32>
    %19 = arith.truncf %18 : vector<8x512xf32> to vector<8x512xbf16>
    %c1 = arith.constant 1 : index
    %c0_11 = arith.constant 0 : index
    %c0_12 = arith.constant 0 : index
    %20 = vector.load %arg3[%c1, %c0_11, %c0_12] : memref<3x512x512xbf16, #tpu.memory_space<vmem>>, vector<1x512x512xbf16>
    %21 = vector.shape_cast %20 : vector<1x512x512xbf16> to vector<512x512xbf16>
    %cst_13 = arith.constant dense<0.000000e+00> : vector<8x512xf32>
    %22 = tpu.matmul %19, %21, %cst_13 {dimension_numbers = #tpu.dot_dimension_numbers<[1], [0], [0], [1], [0, 0, 1, 1], [], []>} : vector<8x512xbf16>, vector<512x512xbf16>, vector<8x512xf32> -> vector<8x512xf32>
    %23 = vector.extract_strided_slice %0 {offsets = [2, 0], sizes = [1, 512], strides = [1, 1]} : vector<4x512xf32> to vector<1x512xf32>
    %24 = vector.broadcast %23 : vector<1x512xf32> to vector<8x512xf32>
    %25 = arith.addf %22, %24 : vector<8x512xf32>
    %cst_14 = arith.constant 0.000000e+00 : f32
    %26 = vector.broadcast %cst_14 : f32 to vector<8x512xf32>
    %27 = arith.maximumf %25, %26 : vector<8x512xf32>
    %28 = arith.truncf %27 : vector<8x512xf32> to vector<8x512xbf16>
    %c2 = arith.constant 2 : index
    %c0_15 = arith.constant 0 : index
    %c0_16 = arith.constant 0 : index
    %29 = vector.load %arg3[%c2, %c0_15, %c0_16] : memref<3x512x512xbf16, #tpu.memory_space<vmem>>, vector<1x512x512xbf16>
    %30 = vector.shape_cast %29 : vector<1x512x512xbf16> to vector<512x512xbf16>
    %cst_17 = arith.constant dense<0.000000e+00> : vector<8x512xf32>
    %31 = tpu.matmul %28, %30, %cst_17 {dimension_numbers = #tpu.dot_dimension_numbers<[1], [0], [0], [1], [0, 0, 1, 1], [], []>} : vector<8x512xbf16>, vector<512x512xbf16>, vector<8x512xf32> -> vector<8x512xf32>
    %32 = vector.extract_strided_slice %0 {offsets = [3, 0], sizes = [1, 512], strides = [1, 1]} : vector<4x512xf32> to vector<1x512xf32>
    %33 = vector.broadcast %32 : vector<1x512xf32> to vector<8x512xf32>
    %34 = arith.addf %31, %33 : vector<8x512xf32>
    %cst_18 = arith.constant 0.000000e+00 : f32
    %35 = vector.broadcast %cst_18 : f32 to vector<8x512xf32>
    %36 = arith.maximumf %34, %35 : vector<8x512xf32>
    %c0_19 = arith.constant 0 : index
    %c0_20 = arith.constant 0 : index
    %37 = vector.load %arg5[%c0_19, %c0_20] : memref<1x512xbf16, #tpu.memory_space<vmem>>, vector<1x512xbf16>
    %38 = arith.extf %37 : vector<1x512xbf16> to vector<1x512xf32>
    %39 = vector.broadcast %38 : vector<1x512xf32> to vector<8x512xf32>
    %40 = arith.mulf %36, %39 : vector<8x512xf32>
    %cst_21 = arith.constant dense<0.000000e+00> : vector<8xf32>
    %41 = vector.multi_reduction <add>, %40, %cst_21 [1] : vector<8x512xf32> to vector<8xf32>
    %42 = vector.shape_cast %41 : vector<8xf32> to vector<8x1xf32>
    %c0_22 = arith.constant 0 : index
    %c0_23 = arith.constant 0 : index
    %43 = memref.load %arg6[%c0_22, %c0_23] : memref<1x1xf32, #tpu.memory_space<smem>>
    %44 = vector.broadcast %43 : f32 to vector<8x1xf32>
    %45 = arith.addf %42, %44 : vector<8x1xf32>
    %c0_24 = arith.constant 0 : index
    %c0_25 = arith.constant 0 : index
    %46 = vector.load %arg7[%c0_24, %c0_25] : memref<8x1xf32, #tpu.memory_space<vmem>>, vector<8x1xf32>
    tpu.vector_store %arg7[%c0_24, %c0_25], %45 {strides = array<i32>} : memref<8x1xf32, #tpu.memory_space<vmem>>, vector<8x1xf32>,
    return
  }
  func.func @transform_0(%arg0: i32) -> (i32, i32) {
    %c0_i32 = arith.constant 0 : i32
    %c0_i32_0 = arith.constant 0 : i32
    return %arg0, %c0_i32 : i32, i32
  }
  func.func @transform_1(%arg0: i32) -> (i32, i32) {
    %c0_i32 = arith.constant 0 : i32
    %c0_i32_0 = arith.constant 0 : i32
    %c0_i32_1 = arith.constant 0 : i32
    return %c0_i32, %c0_i32_0 : i32, i32
  }
  func.func @transform_2(%arg0: i32) -> (i32, i32, i32) {
    %c0_i32 = arith.constant 0 : i32
    %c0_i32_0 = arith.constant 0 : i32
    %c0_i32_1 = arith.constant 0 : i32
    %c0_i32_2 = arith.constant 0 : i32
    return %c0_i32, %c0_i32_0, %c0_i32_1 : i32, i32, i32
  }
  func.func @transform_3(%arg0: i32) -> (i32, i32) {
    %c0_i32 = arith.constant 0 : i32
    %c0_i32_0 = arith.constant 0 : i32
    %c0_i32_1 = arith.constant 0 : i32
    return %c0_i32, %c0_i32_0 : i32, i32
  }
  func.func @transform_4(%arg0: i32) -> (i32, i32) {
    %c0_i32 = arith.constant 0 : i32
    %c0_i32_0 = arith.constant 0 : i32
    %c0_i32_1 = arith.constant 0 : i32
    return %c0_i32, %c0_i32_0 : i32, i32
  }
  func.func @transform_5(%arg0: i32) -> (i32, i32) {
    %c0_i32 = arith.constant 0 : i32
    %c0_i32_0 = arith.constant 0 : i32
    %c0_i32_1 = arith.constant 0 : i32
    return %c0_i32, %c0_i32_0 : i32, i32
  }
  func.func @transform_6(%arg0: i32) -> (i32, i32) {
    %c0_i32 = arith.constant 0 : i32
    %c0_i32_0 = arith.constant 0 : i32
    return %arg0, %c0_i32 : i32, i32
  }
}

</mosaic_0001>

<bundles_post_ra>
// kernel: tpu_custom_call.1
= control target key start
LH: loop header
LB: loop body
LE: loop exit
PB: predicated region body
PF: predicated region fallthrough
CT: control target
= control target key end

     0   :  { %12 = vsyncpa [#allocation4], 0  ;;  %s5068_s0 = inlined_call_operand.hbm [shape: f32[8,256], index: 0, kind: input, shape index: {}]   ;;  %s5069_s1 = inlined_call_operand.hbm [shape: bf16[256,512], index: 1, kind: input, shape index: {}]   ;;  %s5070_s2 = inlined_call_operand.hbm [shape: bf16[3,512,512], index: 2, kind: input, shape index: {}]   ;;  %s5071_s3 = inlined_call_operand.hbm [shape: f32[4,512], index: 3, kind: input, shape index: {}]   ;;  %s5072_s4 = inlined_call_operand.hbm [shape: bf16[1,512], index: 4, kind: input, shape index: {}]   ;;  %s5073_s5 = inlined_call_operand.<no memory space> [shape: f32[1,1], index: 5, kind: input, shape index: {}]   ;;  %s5074_s6 = inlined_call_operand.vmem [shape: f32[8,1], index: 6, kind: output, shape index: {}]  }
   0x1   :  { %13 = vsyncpa [#allocation6], 0 }
   0x2   :  { %14 = vsyncpa [#allocation9], 0  ;;  %s4871_s21 = smov [#allocation5]   ;;  %s4755_s25 = scalar_lea.hbm %s5069_s1, 8192 }
   0x3   :  { %s30_s22 = sshll.u32 %s4871_s21, 4  ;;  %p4756_p0 = scmp.ne.s32.totalorder %s5069_s1, %s4755_s25  ;;  %s31_s22 = int_to_ptr.vmem [resolvable:$true] %s30_s22 }
   0x4   :  { %p4759_p1 = scmp.lt.u32.totalorder %s4755_s25, %s5069_s1 }
   0x6   :  { %p4761_p2 = pnand %p4759_p1, %p4756_p0 }
   0x8   :  { %4764 = shalt.err (!%p4761_p2)
}
   0x9   :  { %s4765_s30 = scalar_lea.vmem %s31_s22, 8192  ;;  %p4770_p4 = scmp.lt.s32.totalorder %s31_s22, %s31_s22 }
   0xa   :  { %p4766_p3 = scmp.ne.s32.totalorder %s31_s22, %s4765_s30  ;;  %p4771_p5 = scmp.lt.s32.totalorder %s4765_s30, %s4765_s30 }
   0xc   :  { %p4772_p6 = por %p4771_p5, %p4770_p4 }
   0xe   :  { %p4773_p7 = pnand %p4772_p6, %p4766_p3 }
  0x10   :  { %4776 = shalt.err (!%p4773_p7)
}
  0x11   :  { %s4872_s7 = smov 256   ;;  %s4873_s8 = smov 16  }
  0x12   :  { %36 = dma.hbm_to_vmem [thread:$0]  %s5069_s1, 8192, %s31_s22, [#allocation6], %s4872_s7, %s4872_s7, %s4873_s8  }
  0x13   :  { %s4874_s11 = smov [#allocation8]   ;;  %s4875_s13 = smov [#allocation3]  }
  0x14   :  { %s55_s12 = sshll.u32 %s4874_s11, 4  ;;  %s21_s14 = sshll.u32 %s4875_s13, 4  ;;  %s56_s12 = int_to_ptr.vmem [resolvable:$true] %s55_s12  ;;  %s22_s14 = int_to_ptr.vmem [resolvable:$true] %s21_s14 }
  0x15   :  { %s4777_s17 = scalar_lea.hbm %s5071_s3, 256 }
  0x16   :  { %p4778_p8 = scmp.ne.s32.totalorder %s5071_s3, %s4777_s17  ;;  %p4781_p9 = scmp.lt.u32.totalorder %s4777_s17, %s5071_s3 }
  0x18   :  { %p4783_p10 = pnand %p4781_p9, %p4778_p8 }
  0x1a   :  { %4786 = shalt.err (!%p4783_p10)
}
  0x1b   :  { %s4787_s1 = scalar_lea.vmem %s56_s12, 256  ;;  %p4792_p12 = scmp.lt.s32.totalorder %s56_s12, %s56_s12 }
  0x1c   :  { %p4788_p11 = scmp.ne.s32.totalorder %s56_s12, %s4787_s1  ;;  %p4793_p13 = scmp.lt.s32.totalorder %s4787_s1, %s4787_s1 }
  0x1e   :  { %p4794_p0 = por %p4793_p13, %p4792_p12 }
  0x20   :  { %p4795_p1 = pnand %p4794_p0, %p4788_p11 }
  0x22   :  { %4798 = shalt.err (!%p4795_p1)
}
  0x23   :  { %58 = dma.hbm_to_vmem [thread:$0]  %s5071_s3, 256, %s56_s12, [#allocation9]  }
  0x24   :  { %s4799_s26 = scalar_lea.hbm %s5068_s0, 256 }
  0x25   :  { %p4800_p2 = scmp.ne.s32.totalorder %s5068_s0, %s4799_s26  ;;  %p4803_p3 = scmp.lt.u32.totalorder %s4799_s26, %s5068_s0 }
  0x27   :  { %p4805_p4 = pnand %p4803_p3, %p4800_p2 }
  0x29   :  { %4808 = shalt.err (!%p4805_p4)
}
  0x2a   :  { %s4809_s9 = scalar_lea.vmem %s22_s14, 256  ;;  %p4814_p6 = scmp.lt.s32.totalorder %s22_s14, %s22_s14 }
  0x2b   :  { %p4810_p5 = scmp.ne.s32.totalorder %s22_s14, %s4809_s9  ;;  %p4815_p7 = scmp.lt.s32.totalorder %s4809_s9, %s4809_s9 }
  0x2d   :  { %p4816_p8 = por %p4815_p7, %p4814_p6 }
  0x2f   :  { %p4817_p9 = pnand %p4816_p8, %p4810_p5 }
  0x31   :  { %4820 = shalt.err (!%p4817_p9)
}
  0x32   :  { %24 = dma.hbm_to_vmem [thread:$0]  %s5068_s0, 256, %s22_s14, [#allocation4]  }
  0x33   :  { %s4876_s11 = smov [#allocation7]   ;;  %s4877_s13 = smov [#allocation10]  }
  0x34   :  { %s42_s12 = sshll.u32 %s4876_s11, 4  ;;  %s65_s15 = sshll.u32 %s4877_s13, 4  ;;  %s43_s12 = int_to_ptr.vmem [resolvable:$true] %s42_s12  ;;  %s66_s15 = int_to_ptr.vmem [resolvable:$true] %s65_s15 }
  0x35   :  { %s4821_s18 = scalar_lea.hbm %s5070_s2, 49152 }
  0x36   :  { %p4822_p10 = scmp.ne.s32.totalorder %s5070_s2, %s4821_s18  ;;  %p4825_p11 = scmp.lt.u32.totalorder %s4821_s18, %s5070_s2 }
  0x38   :  { %p4827_p12 = pnand %p4825_p11, %p4822_p10 }
  0x3a   :  { %4830 = shalt.err (!%p4827_p12)
}
  0x3b   :  { %s4831_s0 = scalar_lea.vmem %s43_s12, 49152  ;;  %p4836_p0 = scmp.lt.s32.totalorder %s43_s12, %s43_s12 }
  0x3c   :  { %p4832_p13 = scmp.ne.s32.totalorder %s43_s12, %s4831_s0  ;;  %p4837_p1 = scmp.lt.s32.totalorder %s4831_s0, %s4831_s0 }
  0x3e   :  { %p4838_p2 = por %p4837_p1, %p4836_p0 }
  0x40   :  { %p4839_p3 = pnand %p4838_p2, %p4832_p13 }
  0x42   :  { %4842 = shalt.err (!%p4839_p3)
}
  0x43   :  { %48 = dma.hbm_to_vmem [thread:$0]  %s5070_s2, 49152, %s43_s12, [#allocation6], %s4872_s7, %s4872_s7, %s4873_s8  }
  0x44   :  { %s4843_s25 = scalar_lea.hbm %s5072_s4, 64 }
  0x45   :  { %p4844_p4 = scmp.ne.s32.totalorder %s5072_s4, %s4843_s25  ;;  %p4847_p5 = scmp.lt.u32.totalorder %s4843_s25, %s5072_s4 }
  0x47   :  { %p4849_p6 = pnand %p4847_p5, %p4844_p4 }
  0x49   :  { %4852 = shalt.err (!%p4849_p6)
}
  0x4a   :  { %s4853_s30 = scalar_lea.vmem %s66_s15, 64  ;;  %p4858_p8 = scmp.lt.s32.totalorder %s66_s15, %s66_s15 }
  0x4b   :  { %p4854_p7 = scmp.ne.s32.totalorder %s66_s15, %s4853_s30  ;;  %p4859_p9 = scmp.lt.s32.totalorder %s4853_s30, %s4853_s30 }
  0x4d   :  { %p4860_p10 = por %p4859_p9, %p4858_p8 }
  0x4f   :  { %p4861_p11 = pnand %p4860_p10, %p4854_p7 }
  0x51   :  { %4864 = shalt.err (!%p4861_p11)
}
  0x52   :  { %68 = dma.hbm_to_vmem [thread:$0]  %s5072_s4, 64, %s66_s15, [#allocation9]  }
  0x53   :  { %4865 = dma.done.wait [#allocation4], 256  }
  0x54   :  { %4866 = vsyncadd [#allocation4], 4294967040 }
  0x55   :  { %4867 = dma.done.wait [#allocation6], 57344  }
  0x56   :  { %4868 = vsyncadd [#allocation6], 4294909952 }
  0x57   :  { %4869 = dma.done.wait [#allocation9], 320  }
  0x58   :  { %4870 = vsyncadd [#allocation9], 4294966976  ;;  %v4081_v0 = vld [vmem:[#allocation5 + $0x4] ss:$16 sps:$4 sm:$0xff]   ;;  %v4083_v1 = vld [vmem:[#allocation5] ss:$16 sps:$4 sm:$0xff]  }
  0x59   :  { %514 = vmatprep.subr.bf16.mxu0 %v4081_v0  ;;  %v4084_v2 = vld [vmem:[#allocation5 + $0x24] ss:$16 sps:$4 sm:$0xff]   ;;  %v4086_v3 = vld [vmem:[#allocation5 + $0x20] ss:$16 sps:$4 sm:$0xff]   ;;  %v4128_v13 = vld [vmem:[#allocation5 + $0xc] ss:$16 sps:$4 sm:$0xff]  }
  0x5a   :  { %515 = vmatpush1.bf16.msra.mxu0 %v4083_v1  ;;  %v4087_v4 = vld [vmem:[#allocation5 + $0x44] ss:$16 sps:$4 sm:$0xff]   ;;  %v4089_v5 = vld [vmem:[#allocation5 + $0x40] ss:$16 sps:$4 sm:$0xff]   ;;  %v4131_v15 = vld [vmem:[#allocation5 + $0x8] ss:$16 sps:$4 sm:$0xff]   ;;  %555 = vmatprep.subr.bf16.mxu1 %v4128_v13 }
  0x5b   :  { %516 = vmatprep.subr.bf16.mxu0 %v4084_v2  ;;  %v4090_v6 = vld [vmem:[#allocation5 + $0x64] ss:$16 sps:$4 sm:$0xff]   ;;  %v4092_v7 = vld [vmem:[#allocation5 + $0x60] ss:$16 sps:$4 sm:$0xff]   ;;  %v89_v16 = vld [vmem:[#allocation3 + $0x8] sm:$0xff]  ;;  %556 = vmatpush1.bf16.msra.mxu1 %v4131_v15  ;;  %vm3581_vm0 = vcmask 7168  }
  0x5c   :  { %v4093_v8 = vld [vmem:[#allocation5 + $0x84] ss:$16 sps:$4 sm:$0xff]   ;;  %v4095_v9 = vld [vmem:[#allocation5 + $0x80] ss:$16 sps:$4 sm:$0xff]   ;;  %v91_v18 = vpack.c.bf16 %v89_v16, %v89_v16  ;;  %v4132_v19 = vld [vmem:[#allocation5 + $0x2c] ss:$16 sps:$4 sm:$0xff]  }
  0x5d   :  { %v4096_v10 = vld [vmem:[#allocation5 + $0xa4] ss:$16 sps:$4 sm:$0xff]   ;;  %v4098_v11 = vld [vmem:[#allocation5 + $0xa0] ss:$16 sps:$4 sm:$0xff]   ;;  %v4134_v20 = vld [vmem:[#allocation5 + $0x28] ss:$16 sps:$4 sm:$0xff]   ;;  %557 = vmatprep.subr.bf16.mxu1 %v4132_v19 }
  0x5e   :  { %517 = vmatpush1.bf16.msra.mxu0 %v4086_v3  ;;  %v4099_v12 = vld [vmem:[#allocation5 + $0xc4] ss:$16 sps:$4 sm:$0xff]   ;;  %v4101_v14 = vld [vmem:[#allocation5 + $0xc0] ss:$16 sps:$4 sm:$0xff]   ;;  %546 = vmatprep.mubr.bf16.mxu0 %v91_v18  ;;  %v4135_v21 = vld [vmem:[#allocation5 + $0x4c] ss:$16 sps:$4 sm:$0xff]  }
  0x5f   :  { %518 = vmatprep.subr.bf16.mxu0 %v4087_v4  ;;  %v4102_v17 = vld [vmem:[#allocation5 + $0xe4] ss:$16 sps:$4 sm:$0xff]   ;;  %587 = vmatprep.mubr.bf16.mxu1 %v91_v18  ;;  %v4104_v22 = vld [vmem:[#allocation5 + $0xe0] ss:$16 sps:$4 sm:$0xff]   ;;  %v4137_v24 = vld [vmem:[#allocation5 + $0x48] ss:$16 sps:$4 sm:$0xff]  }
  0x60   :  { %v4105_v23 = vld [vmem:[#allocation5 + $0x104] ss:$16 sps:$4 sm:$0xff]   ;;  %558 = vmatpush1.bf16.msra.mxu1 %v4134_v20  ;;  %v4138_v25 = vld [vmem:[#allocation5 + $0x6c] ss:$16 sps:$4 sm:$0xff]   ;;  %v4107_v26 = vld [vmem:[#allocation5 + $0x100] ss:$16 sps:$4 sm:$0xff]  }
  0x61   :  { %559 = vmatprep.subr.bf16.mxu1 %v4135_v21  ;;  %v4108_v27 = vld [vmem:[#allocation5 + $0x124] ss:$16 sps:$4 sm:$0xff]   ;;  %v4140_v28 = vld [vmem:[#allocation5 + $0x68] ss:$16 sps:$4 sm:$0xff]   ;;  %v4141_v29 = vld [vmem:[#allocation5 + $0x8c] ss:$16 sps:$4 sm:$0xff]  }
  0x62   :  { %519 = vmatpush1.bf16.msra.mxu0 %v4089_v5  ;;  %v4110_v30 = vld [vmem:[#allocation5 + $0x120] ss:$16 sps:$4 sm:$0xff]   ;;  %v4111_v31 = vld [vmem:[#allocation5 + $0x144] ss:$16 sps:$4 sm:$0xff]   ;;  %v4143_v32 = vld [vmem:[#allocation5 + $0x88] ss:$16 sps:$4 sm:$0xff]  }
  0x63   :  { %520 = vmatprep.subr.bf16.mxu0 %v4090_v6  ;;  %v4144_v33 = vld [vmem:[#allocation5 + $0xac] ss:$16 sps:$4 sm:$0xff]   ;;  %v4113_v34 = vld [vmem:[#allocation5 + $0x140] ss:$16 sps:$4 sm:$0xff]   ;;  %v4114_v35 = vld [vmem:[#allocation5 + $0x164] ss:$16 sps:$4 sm:$0xff]  }
  0x64   :  { %560 = vmatpush1.bf16.msra.mxu1 %v4137_v24  ;;  %v4146_v36 = vld [vmem:[#allocation5 + $0xa8] ss:$16 sps:$4 sm:$0xff]   ;;  %v4147_v37 = vld [vmem:[#allocation5 + $0xcc] ss:$16 sps:$4 sm:$0xff]   ;;  %v4116_v38 = vld [vmem:[#allocation5 + $0x160] ss:$16 sps:$4 sm:$0xff]  }
  0x65   :  { %561 = vmatprep.subr.bf16.mxu1 %v4138_v25  ;;  %v4117_v39 = vld [vmem:[#allocation5 + $0x184] ss:$16 sps:$4 sm:$0xff]   ;;  %v4149_v40 = vld [vmem:[#allocation5 + $0xc8] ss:$16 sps:$4 sm:$0xff]   ;;  %v4150_v41 = vld [vmem:[#allocation5 + $0xec] ss:$16 sps:$4 sm:$0xff]  }
  0x66   :  { %521 = vmatpush1.bf16.msra.mxu0 %v4092_v7  ;;  %v4119_v42 = vld [vmem:[#allocation5 + $0x180] ss:$16 sps:$4 sm:$0xff]   ;;  %v4120_v43 = vld [vmem:[#allocation5 + $0x1a4] ss:$16 sps:$4 sm:$0xff]   ;;  %v4152_v44 = vld [vmem:[#allocation5 + $0xe8] ss:$16 sps:$4 sm:$0xff]  }
  0x67   :  { %522 = vmatprep.subr.bf16.mxu0 %v4093_v8  ;;  %v4153_v45 = vld [vmem:[#allocation5 + $0x10c] ss:$16 sps:$4 sm:$0xff]   ;;  %v4122_v46 = vld [vmem:[#allocation5 + $0x1a0] ss:$16 sps:$4 sm:$0xff]   ;;  %v4123_v47 = vld [vmem:[#allocation5 + $0x1c4] ss:$16 sps:$4 sm:$0xff]  }
  0x68   :  { %562 = vmatpush1.bf16.msra.mxu1 %v4140_v28  ;;  %v4155_v48 = vld [vmem:[#allocation5 + $0x108] ss:$16 sps:$4 sm:$0xff]   ;;  %v4156_v49 = vld [vmem:[#allocation5 + $0x12c] ss:$16 sps:$4 sm:$0xff]   ;;  %v4125_v50 = vld [vmem:[#allocation5 + $0x1c0] ss:$16 sps:$4 sm:$0xff]  }
  0x69   :  { %563 = vmatprep.subr.bf16.mxu1 %v4141_v29  ;;  %v4126_v51 = vld [vmem:[#allocation5 + $0x1e4] ss:$16 sps:$4 sm:$0xff]   ;;  %v4158_v52 = vld [vmem:[#allocation5 + $0x128] ss:$16 sps:$4 sm:$0xff]   ;;  %v4159_v53 = vld [vmem:[#allocation5 + $0x14c] ss:$16 sps:$4 sm:$0xff]  }
  0x6a   :  { %523 = vmatpush1.bf16.msra.mxu0 %v4095_v9  ;;  %v4130_v54 = vld [vmem:[#allocation5 + $0x1e0] ss:$16 sps:$4 sm:$0xff]   ;;  %v4161_v56 = vld [vmem:[#allocation5 + $0x148] ss:$16 sps:$4 sm:$0xff]   ;;  %v4179_v57 = vld [vmem:[#allocation7 + $0x4] ss:$16 sps:$4 sm:$0xff]  }
  0x6b   :  { %524 = vmatprep.subr.bf16.mxu0 %v4096_v10  ;;  %v88_v55 = vld [vmem:[#allocation3] sm:$0xff]  ;;  %v4162_v58 = vld [vmem:[#allocation5 + $0x16c] ss:$16 sps:$4 sm:$0xff]   ;;  %v4164_v61 = vld [vmem:[#allocation5 + $0x168] ss:$16 sps:$4 sm:$0xff]  }
  0x6c   :  { %564 = vmatpush1.bf16.msra.mxu1 %v4143_v32  ;;  %v90_v59 = vpack.c.bf16 %v88_v55, %v88_v55  ;;  %v4177_v60 = vld [vmem:[#allocation7] ss:$16 sps:$4 sm:$0xff]   ;;  %v4185_v62 = vld [vmem:[#allocation7 + $0x24] ss:$16 sps:$4 sm:$0xff]   ;;  %v4165_v63 = vld [vmem:[#allocation5 + $0x18c] ss:$16 sps:$4 sm:$0xff]  }
  0x6d   :  { %565 = vmatprep.subr.bf16.mxu1 %v4144_v33  ;;  %v4183_v0 = vld [vmem:[#allocation7 + $0x20] ss:$16 sps:$4 sm:$0xff]   ;;  %v4167_v1 = vld [vmem:[#allocation5 + $0x188] ss:$16 sps:$4 sm:$0xff]   ;;  %v4191_v2 = vld [vmem:[#allocation7 + $0x44] ss:$16 sps:$4 sm:$0xff]  }
  0x6e   :  { %525 = vmatpush1.bf16.msra.mxu0 %v4098_v11  ;;  %v4168_v3 = vld [vmem:[#allocation5 + $0x1ac] ss:$16 sps:$4 sm:$0xff]   ;;  %v4189_v4 = vld [vmem:[#allocation7 + $0x40] ss:$16 sps:$4 sm:$0xff]   ;;  %v4170_v5 = vld [vmem:[#allocation5 + $0x1a8] ss:$16 sps:$4 sm:$0xff]  }
  0x6f   :  { %526 = vmatprep.subr.bf16.mxu0 %v4099_v12  ;;  %v4197_v6 = vld [vmem:[#allocation7 + $0x64] ss:$16 sps:$4 sm:$0xff]   ;;  %v4171_v7 = vld [vmem:[#allocation5 + $0x1cc] ss:$16 sps:$4 sm:$0xff]   ;;  %v4195_v8 = vld [vmem:[#allocation7 + $0x60] ss:$16 sps:$4 sm:$0xff]  }
  0x70   :  { %566 = vmatpush1.bf16.msra.mxu1 %v4146_v36  ;;  %v4173_v9 = vld [vmem:[#allocation5 + $0x1c8] ss:$16 sps:$4 sm:$0xff]   ;;  %v4203_v10 = vld [vmem:[#allocation7 + $0x84] ss:$16 sps:$4 sm:$0xff]   ;;  %v4174_v11 = vld [vmem:[#allocation5 + $0x1ec] ss:$16 sps:$4 sm:$0xff]  }
  0x71   :  { %567 = vmatprep.subr.bf16.mxu1 %v4147_v37  ;;  %v4201_v12 = vld [vmem:[#allocation7 + $0x80] ss:$16 sps:$4 sm:$0xff]   ;;  %v4176_v13 = vld [vmem:[#allocation5 + $0x1e8] ss:$16 sps:$4 sm:$0xff]   ;;  %v4209_v15 = vld [vmem:[#allocation7 + $0xa4] ss:$16 sps:$4 sm:$0xff]  }
  0x72   :  { %527 = vmatpush1.bf16.msra.mxu0 %v4101_v14  ;;  %v4182_v14 = vld [vmem:[#allocation7 + $0xc] ss:$16 sps:$4 sm:$0xff]   ;;  %v4207_v16 = vld [vmem:[#allocation7 + $0xa0] ss:$16 sps:$4 sm:$0xff]   ;;  %v4215_v18 = vld [vmem:[#allocation7 + $0xc4] ss:$16 sps:$4 sm:$0xff]  }
  0x73   :  { %528 = vmatprep.subr.bf16.mxu0 %v4102_v17  ;;  %v4180_v17 = vld [vmem:[#allocation7 + $0x8] ss:$16 sps:$4 sm:$0xff]   ;;  %v4188_v19 = vld [vmem:[#allocation7 + $0x2c] ss:$16 sps:$4 sm:$0xff]   ;;  %v4213_v20 = vld [vmem:[#allocation7 + $0xc0] ss:$16 sps:$4 sm:$0xff]  }
  0x74   :  { %568 = vmatpush1.bf16.msra.mxu1 %v4149_v40  ;;  %v4186_v21 = vld [vmem:[#allocation7 + $0x28] ss:$16 sps:$4 sm:$0xff]   ;;  %v4219_v24 = vld [vmem:[#allocation7 + $0xe0] ss:$16 sps:$4 sm:$0xff]  }
  0x75   :  { %569 = vmatprep.subr.bf16.mxu1 %v4150_v41  ;;  %v4192_v25 = vld [vmem:[#allocation7 + $0x48] ss:$16 sps:$4 sm:$0xff]   ;;  %v4225_v28 = vld [vmem:[#allocation7 + $0x100] ss:$16 sps:$4 sm:$0xff]  }
  0x76   :  { %529 = vmatpush1.bf16.msra.mxu0 %v4104_v22  ;;  %v4221_v22 = vld [vmem:[#allocation7 + $0xe4] ss:$16 sps:$4 sm:$0xff]   ;;  %v4198_v29 = vld [vmem:[#allocation7 + $0x68] ss:$16 sps:$4 sm:$0xff]   ;;  %v4231_v32 = vld [vmem:[#allocation7 + $0x120] ss:$16 sps:$4 sm:$0xff]  }
  0x77   :  { %530 = vmatprep.subr.bf16.mxu0 %v4105_v23  ;;  %v4194_v23 = vld [vmem:[#allocation7 + $0x4c] ss:$16 sps:$4 sm:$0xff]   ;;  %v4204_v33 = vld [vmem:[#allocation7 + $0x88] ss:$16 sps:$4 sm:$0xff]   ;;  %v4237_v36 = vld [vmem:[#allocation7 + $0x140] ss:$16 sps:$4 sm:$0xff]  }
  0x78   :  { %570 = vmatpush1.bf16.msra.mxu1 %v4152_v44  ;;  %v4210_v37 = vld [vmem:[#allocation7 + $0xa8] ss:$16 sps:$4 sm:$0xff]   ;;  %v4243_v40 = vld [vmem:[#allocation7 + $0x160] ss:$16 sps:$4 sm:$0xff]  }
  0x79   :  { %571 = vmatprep.subr.bf16.mxu1 %v4153_v45  ;;  %v4216_v41 = vld [vmem:[#allocation7 + $0xc8] ss:$16 sps:$4 sm:$0xff]   ;;  %v4249_v44 = vld [vmem:[#allocation7 + $0x180] ss:$16 sps:$4 sm:$0xff]  }
  0x7a   :  { %531 = vmatpush1.bf16.msra.mxu0 %v4107_v26  ;;  %v4227_v26 = vld [vmem:[#allocation7 + $0x104] ss:$16 sps:$4 sm:$0xff]   ;;  %v4222_v45 = vld [vmem:[#allocation7 + $0xe8] ss:$16 sps:$4 sm:$0xff]  }
  0x7b   :  { %532 = vmatprep.subr.bf16.mxu0 %v4108_v27  ;;  %v4200_v27 = vld [vmem:[#allocation7 + $0x6c] ss:$16 sps:$4 sm:$0xff]   ;;  %v4246_v55 = vld [vmem:[#allocation7 + $0x168] ss:$16 sps:$4 sm:$0xff]  }
  0x7c   :  { %572 = vmatpush1.bf16.msra.mxu1 %v4155_v48  ;;  %v4255_v48 = vld [vmem:[#allocation7 + $0x1a0] ss:$16 sps:$4 sm:$0xff]  }
  0x7d   :  { %573 = vmatprep.subr.bf16.mxu1 %v4156_v49  ;;  %v4228_v49 = vld [vmem:[#allocation7 + $0x108] ss:$16 sps:$4 sm:$0xff]  }
  0x7e   :  { %533 = vmatpush1.bf16.msra.mxu0 %v4110_v30  ;;  %v4233_v30 = vld [vmem:[#allocation7 + $0x124] ss:$16 sps:$4 sm:$0xff]  }
  0x7f   :  { %534 = vmatprep.subr.bf16.mxu0 %v4111_v31  ;;  %v4206_v31 = vld [vmem:[#allocation7 + $0x8c] ss:$16 sps:$4 sm:$0xff]  }
  0x80   :  { %574 = vmatpush1.bf16.msra.mxu1 %v4158_v52  ;;  %v4242_v52 = vld [vmem:[#allocation7 + $0x14c] ss:$16 sps:$4 sm:$0xff]  }
  0x81   :  { %575 = vmatprep.subr.bf16.mxu1 %v4159_v53  ;;  %v4240_v53 = vld [vmem:[#allocation7 + $0x148] ss:$16 sps:$4 sm:$0xff]  }
  0x82   :  { %535 = vmatpush1.bf16.msra.mxu0 %v4113_v34  ;;  %v4239_v34 = vld [vmem:[#allocation7 + $0x144] ss:$16 sps:$4 sm:$0xff]  }
  0x83   :  { %536 = vmatprep.subr.bf16.mxu0 %v4114_v35  ;;  %v4212_v35 = vld [vmem:[#allocation7 + $0xac] ss:$16 sps:$4 sm:$0xff]  }
  0x84   :  { %576 = vmatpush1.bf16.msra.mxu1 %v4161_v56  ;;  %v4254_v56 = vld [vmem:[#allocation7 + $0x18c] ss:$16 sps:$4 sm:$0xff]  }
  0x85   :  { %577 = vmatprep.subr.bf16.mxu1 %v4162_v58  ;;  %v4260_v58 = vld [vmem:[#allocation7 + $0x1ac] ss:$16 sps:$4 sm:$0xff]  }
  0x86   :  { %537 = vmatpush1.bf16.msra.mxu0 %v4116_v38  ;;  %v4245_v38 = vld [vmem:[#allocation7 + $0x164] ss:$16 sps:$4 sm:$0xff]  }
  0x87   :  { %538 = vmatprep.subr.bf16.mxu0 %v4117_v39  ;;  %v4218_v39 = vld [vmem:[#allocation7 + $0xcc] ss:$16 sps:$4 sm:$0xff]  }
  0x88   :  { %578 = vmatpush1.bf16.msra.mxu1 %v4164_v61  ;;  %v4266_v61 = vld [vmem:[#allocation7 + $0x1cc] ss:$16 sps:$4 sm:$0xff]  }
  0x89   :  { %579 = vmatprep.subr.bf16.mxu1 %v4165_v63  ;;  %v4264_v63 = vld [vmem:[#allocation7 + $0x1c8] ss:$16 sps:$4 sm:$0xff]  }
  0x8a   :  { %539 = vmatpush1.bf16.msra.mxu0 %v4119_v42  ;;  %v4251_v42 = vld [vmem:[#allocation7 + $0x184] ss:$16 sps:$4 sm:$0xff]  }
  0x8b   :  { %540 = vmatprep.subr.bf16.mxu0 %v4120_v43  ;;  %v4224_v43 = vld [vmem:[#allocation7 + $0xec] ss:$16 sps:$4 sm:$0xff]  }
  0x8c   :  { %580 = vmatpush1.bf16.msra.mxu1 %v4167_v1  ;;  %v4272_v1 = vld [vmem:[#allocation7 + $0x1ec] ss:$16 sps:$4 sm:$0xff]  }
  0x8d   :  { %581 = vmatprep.subr.bf16.mxu1 %v4168_v3  ;;  %v4270_v3 = vld [vmem:[#allocation7 + $0x1e8] ss:$16 sps:$4 sm:$0xff]  }
  0x8e   :  { %541 = vmatpush1.bf16.msra.mxu0 %v4122_v46  ;;  %v4257_v46 = vld [vmem:[#allocation7 + $0x1a4] ss:$16 sps:$4 sm:$0xff]  }
  0x8f   :  { %542 = vmatprep.subr.bf16.mxu0 %v4123_v47  ;;  %v4230_v47 = vld [vmem:[#allocation7 + $0x10c] ss:$16 sps:$4 sm:$0xff]  }
  0x90   :  { %582 = vmatpush1.bf16.msra.mxu1 %v4170_v5  ;;  %v4278_v5 = vld [vmem:[#allocation7 + $0x20c] ss:$16 sps:$4 sm:$0xff]  }
  0x91   :  { %583 = vmatprep.subr.bf16.mxu1 %v4171_v7 }
  0x92   :  { %543 = vmatpush1.bf16.msra.mxu0 %v4125_v50  ;;  %v4236_v50 = vld [vmem:[#allocation7 + $0x12c] ss:$16 sps:$4 sm:$0xff]  }
  0x93   :  { %544 = vmatprep.subr.bf16.mxu0 %v4126_v51  ;;  %v4234_v51 = vld [vmem:[#allocation7 + $0x128] ss:$16 sps:$4 sm:$0xff]  }
  0x94   :  { %584 = vmatpush1.bf16.msra.mxu1 %v4173_v9  ;;  %v4984_v9 = vld [vmem:[#allocation8] sm:$0xff] }
  0x95   :  { %585 = vmatprep.subr.bf16.mxu1 %v4174_v11 }
  0x96   :  { %545 = vmatpush1.bf16.msra.mxu0 %v4130_v54  ;;  %v4248_v54 = vld [vmem:[#allocation7 + $0x16c] ss:$16 sps:$4 sm:$0xff]  }
  0x97   :  { %1408 = vmatprep.subr.bf16.mxu0 %v4179_v57  ;;  %v4252_v57 = vld [vmem:[#allocation7 + $0x188] ss:$16 sps:$4 sm:$0xff]  }
  0x98   :  { %586 = vmatpush1.bf16.msra.mxu1 %v4176_v13 }
  0x99   :  { %547 = vmatmul.mubr.bf16.vlgmr.msra.gmra.mrb[0].mxu0 %v90_v59  ;;  %1490 = vmatprep.subr.bf16.mxu1 %v4182_v14 }
  0x9a   :  { %1409 = vmatpush1.bf16.msra.mxu0 %v4177_v60  ;;  %v4263_v60 = vld [vmem:[#allocation7 + $0x1c4] ss:$16 sps:$4 sm:$0xff]  }
  0x9b   :  { %1410 = vmatprep.subr.bf16.mxu0 %v4185_v62  ;;  %588 = vmatmul.mubr.bf16.vlgmr.msra.gmra.mrb[0].mxu1 %v90_v59  ;;  %v4258_v59 = vld [vmem:[#allocation7 + $0x1a8] ss:$16 sps:$4 sm:$0xff]   ;;  %v4261_v62 = vld [vmem:[#allocation7 + $0x1c0] ss:$16 sps:$4 sm:$0xff]  }
  0x9c   :  { %1491 = vmatpush1.bf16.msra.mxu1 %v4180_v17 }
  0x9d   :  { %1492 = vmatprep.subr.bf16.mxu1 %v4188_v19 }
  0x9e   :  { %1411 = vmatpush1.bf16.msra.mxu0 %v4183_v0  ;;  %v4269_v0 = vld [vmem:[#allocation7 + $0x1e4] ss:$16 sps:$4 sm:$0xff]  }
  0x9f   :  { %1412 = vmatprep.subr.bf16.mxu0 %v4191_v2  ;;  %v4267_v2 = vld [vmem:[#allocation7 + $0x1e0] ss:$16 sps:$4 sm:$0xff]  }
  0xa0   :  { %1493 = vmatpush1.bf16.msra.mxu1 %v4186_v21 }
  0xa1   :  { %1494 = vmatprep.subr.bf16.mxu1 %v4194_v23 }
  0xa2   :  { %1413 = vmatpush1.bf16.msra.mxu0 %v4189_v4  ;;  %v4275_v4 = vld [vmem:[#allocation7 + $0x204] ss:$16 sps:$4 sm:$0xff]  }
  0xa3   :  { %1414 = vmatprep.subr.bf16.mxu0 %v4197_v6  ;;  %v158_v6 = vlaneseq }
  0xa4   :  { %1495 = vmatpush1.bf16.msra.mxu1 %v4192_v25  ;;  %v4276_v25 = vld [vmem:[#allocation7 + $0x208] ss:$16 sps:$4 sm:$0xff]  }
  0xa5   :  { %1496 = vmatprep.subr.bf16.mxu1 %v4200_v27  ;;  %v4979_v7 = vshrl.u32 %v158_v6, 7  ;;  %v4281_v27 = vld [vmem:[#allocation7 + $0x224] ss:$16 sps:$4 sm:$0xff]   ;;  %v4332_v6 = vld [vmem:[#allocation7 + $0x32c] ss:$16 sps:$4 sm:$0xff]  }
  0xa6   :  { %1415 = vmatpush1.bf16.msra.mxu0 %v4195_v8 }
  0xa7   :  { %1416 = vmatprep.subr.bf16.mxu0 %v4203_v10  ;;  %v4982_v8 = vsub.s32 0, %v4979_v7  ;;  %v4987_v10 = vsub.s32 4, %v4979_v7 }
  0xa8   :  { %1497 = vmatpush1.bf16.msra.mxu1 %v4198_v29  ;;  %v4279_v29 = vld [vmem:[#allocation7 + $0x220] ss:$16 sps:$4 sm:$0xff]  }
  0xa9   :  { %1498 = vmatprep.subr.bf16.mxu1 %v4206_v31  ;;  %v161_v11 = vrot.slane %v4984_v9, %v4982_v8  ;;  %v4287_v31 = vld [vmem:[#allocation7 + $0x244] ss:$16 sps:$4 sm:$0xff]  }
  0xaa   :  { %1417 = vmatpush1.bf16.msra.mxu0 %v4201_v12  ;;  %v165_v12 = vrot.slane %v4984_v9, %v4987_v10 }
  0xab   :  { %1418 = vmatprep.subr.bf16.mxu0 %v4209_v15  ;;  %v181_v13 = vrot.slane %v161_v11, %v4982_v8  ;;  %v4327_v11 = vld [vmem:[#allocation7 + $0x320] ss:$16 sps:$4 sm:$0xff]  }
  0xac   :  { %1499 = vmatpush1.bf16.msra.mxu1 %v4204_v33  ;;  %v185_v14 = vrot.slane %v165_v12, %v4982_v8  ;;  %v4995_v33 = vld [vmem:[#allocation8 + $0x8] sm:$0xff] }
  0xad   :  { %1500 = vmatprep.subr.bf16.mxu1 %v4212_v35  ;;  %v4288_v35 = vld [vmem:[#allocation7 + $0x248] ss:$16 sps:$4 sm:$0xff]  }
  0xae   :  { %1419 = vmatpush1.bf16.msra.mxu0 %v4207_v16  ;;  %v4330_v12 = vld [vmem:[#allocation7 + $0x328] ss:$16 sps:$4 sm:$0xff]  }
  0xaf   :  { %1420 = vmatprep.subr.bf16.mxu0 %v4215_v18 }
  0xb0   :  { %1501 = vmatpush1.bf16.msra.mxu1 %v4210_v37  ;;  %v4296_v37 = vld [vmem:[#allocation7 + $0x26c] ss:$16 sps:$4 sm:$0xff]  }
  0xb1   :  { %1502 = vmatprep.subr.bf16.mxu1 %v4218_v39  ;;  %v4291_v39 = vld [vmem:[#allocation7 + $0x260] ss:$16 sps:$4 sm:$0xff]  }
  0xb2   :  { %1421 = vmatpush1.bf16.msra.mxu0 %v4213_v20 }
  0xb3   :  { %1422 = vmatprep.subr.bf16.mxu0 %v4221_v22 }
  0xb4   :  { %1503 = vmatpush1.bf16.msra.mxu1 %v4216_v41  ;;  %v4299_v41 = vld [vmem:[#allocation7 + $0x284] ss:$16 sps:$4 sm:$0xff]  }
  0xb5   :  { %1504 = vmatprep.subr.bf16.mxu1 %v4224_v43 }
  0xb6   :  { %1423 = vmatpush1.bf16.msra.mxu0 %v4219_v24  ;;  %v4273_v24 = vld [vmem:[#allocation7 + $0x200] ss:$16 sps:$4 sm:$0xff]  }
  0xb7   :  { %1424 = vmatprep.subr.bf16.mxu0 %v4227_v26 }
  0xb8   :  { %1505 = vmatpush1.bf16.msra.mxu1 %v4222_v45  ;;  %v4297_v45 = vld [vmem:[#allocation7 + $0x280] ss:$16 sps:$4 sm:$0xff]  }
  0xb9   :  { %1506 = vmatprep.subr.bf16.mxu1 %v4230_v47 }
  0xba   :  { %1425 = vmatpush1.bf16.msra.mxu0 %v4225_v28  ;;  %v4284_v28 = vld [vmem:[#allocation7 + $0x22c] ss:$16 sps:$4 sm:$0xff]  }
  0xbb   :  { %1426 = vmatprep.subr.bf16.mxu0 %v4233_v30  ;;  %v4282_v30 = vld [vmem:[#allocation7 + $0x228] ss:$16 sps:$4 sm:$0xff]  }
  0xbc   :  { %1507 = vmatpush1.bf16.msra.mxu1 %v4228_v49  ;;  %v4308_v49 = vld [vmem:[#allocation7 + $0x2ac] ss:$16 sps:$4 sm:$0xff]  }
  0xbd   :  { %1508 = vmatprep.subr.bf16.mxu1 %v4236_v50 }
  0xbe   :  { %1427 = vmatpush1.bf16.msra.mxu0 %v4231_v32  ;;  %v4290_v32 = vld [vmem:[#allocation7 + $0x24c] ss:$16 sps:$4 sm:$0xff]  }
  0xbf   :  { %1428 = vmatprep.subr.bf16.mxu0 %v4239_v34  ;;  %v4285_v34 = vld [vmem:[#allocation7 + $0x240] ss:$16 sps:$4 sm:$0xff]  }
  0xc0   :  { %1509 = vmatpush1.bf16.msra.mxu1 %v4234_v51 }
  0xc1   :  { %1510 = vmatprep.subr.bf16.mxu1 %v4242_v52 }
  0xc2   :  { %1429 = vmatpush1.bf16.msra.mxu0 %v4237_v36  ;;  %v4293_v36 = vld [vmem:[#allocation7 + $0x264] ss:$16 sps:$4 sm:$0xff]  }
  0xc3   :  { %1430 = vmatprep.subr.bf16.mxu0 %v4245_v38  ;;  %v173_v38 = vrot.slane %v4995_v33, %v4987_v10 }
  0xc4   :  { %1511 = vmatpush1.bf16.msra.mxu1 %v4240_v53 }
  0xc5   :  { %1512 = vmatprep.subr.bf16.mxu1 %v4248_v54  ;;  %v193_v43 = vrot.slane %v173_v38, %v4982_v8  ;;  %v4303_v54 = vld [vmem:[#allocation7 + $0x2a0] ss:$16 sps:$4 sm:$0xff]   ;;  %v4368_v38 = vld [vmem:[#allocation7 + $0x3ec] ss:$16 sps:$4 sm:$0xff]  }
  0xc6   :  { %1431 = vmatpush1.bf16.msra.mxu0 %v4243_v40  ;;  %v4294_v40 = vld [vmem:[#allocation7 + $0x268] ss:$16 sps:$4 sm:$0xff]  }
  0xc7   :  { %1432 = vmatprep.subr.bf16.mxu0 %v4251_v42  ;;  %v4302_v42 = vld [vmem:[#allocation7 + $0x28c] ss:$16 sps:$4 sm:$0xff]  }
  0xc8   :  { %1513 = vmatpush1.bf16.msra.mxu1 %v4246_v55  ;;  %v4306_v55 = vld [vmem:[#allocation7 + $0x2a8] ss:$16 sps:$4 sm:$0xff]  }
  0xc9   :  { %1514 = vmatprep.subr.bf16.mxu1 %v4254_v56  ;;  %v4311_v56 = vld [vmem:[#allocation7 + $0x2c4] ss:$16 sps:$4 sm:$0xff]  }
  0xca   :  { %1433 = vmatpush1.bf16.msra.mxu0 %v4249_v44 }
  0xcb   :  { %1434 = vmatprep.subr.bf16.mxu0 %v4257_v46  ;;  %v4300_v46 = vld [vmem:[#allocation7 + $0x288] ss:$16 sps:$4 sm:$0xff]  }
  0xcc   :  { %1515 = vmatpush1.bf16.msra.mxu1 %v4252_v57  ;;  %v4314_v57 = vld [vmem:[#allocation7 + $0x2cc] ss:$16 sps:$4 sm:$0xff]  }
  0xcd   :  { %1516 = vmatprep.subr.bf16.mxu1 %v4260_v58 }
  0xce   :  { %1435 = vmatpush1.bf16.msra.mxu0 %v4255_v48  ;;  %v4305_v48 = vld [vmem:[#allocation7 + $0x2a4] ss:$16 sps:$4 sm:$0xff]  }
  0xcf   :  { %1436 = vmatprep.subr.bf16.mxu0 %v4263_v60  ;;  %v4312_v60 = vld [vmem:[#allocation7 + $0x2c8] ss:$16 sps:$4 sm:$0xff]  }
  0xd0   :  { %1517 = vmatpush1.bf16.msra.mxu1 %v4258_v59  ;;  %v4309_v59 = vld [vmem:[#allocation7 + $0x2c0] ss:$16 sps:$4 sm:$0xff]  }
  0xd1   :  { %1518 = vmatprep.subr.bf16.mxu1 %v4266_v61  ;;  %v4317_v61 = vld [vmem:[#allocation7 + $0x2e4] ss:$16 sps:$4 sm:$0xff]  }
  0xd2   :  { %1437 = vmatpush1.bf16.msra.mxu0 %v4261_v62  ;;  %v4320_v62 = vld [vmem:[#allocation7 + $0x2ec] ss:$16 sps:$4 sm:$0xff]  }
  0xd3   :  { %1438 = vmatprep.subr.bf16.mxu0 %v4269_v0  ;;  %v4318_v0 = vld [vmem:[#allocation7 + $0x2e8] ss:$16 sps:$4 sm:$0xff]  }
  0xd4   :  { %1519 = vmatpush1.bf16.msra.mxu1 %v4264_v63  ;;  %v4315_v63 = vld [vmem:[#allocation7 + $0x2e0] ss:$16 sps:$4 sm:$0xff]  }
  0xd5   :  { %1520 = vmatprep.subr.bf16.mxu1 %v4272_v1  ;;  %v4323_v1 = vld [vmem:[#allocation7 + $0x304] ss:$16 sps:$4 sm:$0xff]  }
  0xd6   :  { %1439 = vmatpush1.bf16.msra.mxu0 %v4267_v2  ;;  %v4326_v2 = vld [vmem:[#allocation7 + $0x30c] ss:$16 sps:$4 sm:$0xff]  }
  0xd7   :  { %1449 = vmatprep.subr.bf16.mxu0 %v4275_v4  ;;  %v4324_v4 = vld [vmem:[#allocation7 + $0x308] ss:$16 sps:$4 sm:$0xff]  }
  0xd8   :  { %1521 = vmatpush1.bf16.msra.mxu1 %v4270_v3  ;;  %v4321_v3 = vld [vmem:[#allocation7 + $0x300] ss:$16 sps:$4 sm:$0xff]  }
  0xd9   :  { %1531 = vmatprep.subr.bf16.mxu1 %v4278_v5  ;;  %v4329_v5 = vld [vmem:[#allocation7 + $0x324] ss:$16 sps:$4 sm:$0xff]  }
 0x16c   :  { %v548_v15 = vpop.f32.mrb[0].mxu0 }
 0x16d   :  { %v549_v16 = vadd.f32 %v548_v15, %v181_v13  ;;  %v550_v17 = vpop.f32.mrb[1].mxu0  ;;  %v4335_v13 = vld [vmem:[#allocation7 + $0x344] ss:$16 sps:$4 sm:$0xff]   ;;  %v4333_v15 = vld [vmem:[#allocation7 + $0x340] ss:$16 sps:$4 sm:$0xff]  }
 0x16e   :  { %v551_v18 = vadd.f32 %v550_v17, %v185_v14  ;;  %v552_v19 = vpop.f32.mrb[2].mxu0  ;;  %v5000_v44 = vpop.f32.mrb[0].mxu1  ;;  %v4338_v14 = vld [vmem:[#allocation7 + $0x34c] ss:$16 sps:$4 sm:$0xff]   ;;  %v4341_v17 = vld [vmem:[#allocation7 + $0x364] ss:$16 sps:$4 sm:$0xff]  }
 0x16f   :  { %v596_v20 = vmax.f32 %v549_v16, 0.0  ;;  %v553_v21 = vpop.f32.mrb[3].mxu0  ;;  %v591_v47 = vpop.f32.mrb[1].mxu1  ;;  %v4336_v16 = vld [vmem:[#allocation7 + $0x348] ss:$16 sps:$4 sm:$0xff]  }
 0x170   :  { %v597_v22 = vmax.f32 %v551_v18, 0.0  ;;  %v592_v50 = vadd.f32 %v591_v47, %v193_v43  ;;  %v593_v51 = vpop.f32.mrb[2].mxu1  ;;  %v4344_v18 = vld [vmem:[#allocation7 + $0x36c] ss:$16 sps:$4 sm:$0xff]   ;;  %v4339_v19 = vld [vmem:[#allocation7 + $0x360] ss:$16 sps:$4 sm:$0xff]  }
 0x171   :  { %v600_v26 = vpack.c.bf16 %v596_v20, %v596_v20  ;;  %v594_v52 = vpop.f32.mrb[3].mxu1  ;;  %v4342_v20 = vld [vmem:[#allocation7 + $0x368] ss:$16 sps:$4 sm:$0xff]   ;;  %v4347_v21 = vld [vmem:[#allocation7 + $0x384] ss:$16 sps:$4 sm:$0xff]  }
 0x172   :  { %v601_v23 = vpack.c.bf16 %v597_v22, %v597_v22  ;;  %v599_v53 = vmax.f32 %v592_v50, 0.0  ;;  %v4350_v22 = vld [vmem:[#allocation7 + $0x38c] ss:$16 sps:$4 sm:$0xff]   ;;  %v4378_v50 = vld [vmem:[#allocation7 + $0x428] ss:$16 sps:$4 sm:$0xff]  }
 0x173   :  { %v4374_v43 = vld [vmem:[#allocation7 + $0x40c] ss:$16 sps:$4 sm:$0xff]   ;;  %v4383_v51 = vld [vmem:[#allocation7 + $0x444] ss:$16 sps:$4 sm:$0xff]  }
 0x174   :  { %1440 = vmatprep.mubr.bf16.mxu0 %v601_v23  ;;  %1522 = vmatprep.mubr.bf16.mxu1 %v601_v23  ;;  %v603_v58 = vpack.c.bf16 %v599_v53, %v599_v53  ;;  %v4345_v23 = vld [vmem:[#allocation7 + $0x380] ss:$16 sps:$4 sm:$0xff]   ;;  %v4386_v52 = vld [vmem:[#allocation7 + $0x44c] ss:$16 sps:$4 sm:$0xff]  }
 0x175   :  { %1441 = vmatmul.mubr.bf16.vlgmr.msra.gmra.mrb[4].mxu0 %v600_v26  ;;  %1523 = vmatmul.mubr.bf16.vlgmr.msra.gmra.mrb[4].mxu1 %v600_v26  ;;  %v4353_v26 = vld [vmem:[#allocation7 + $0x3a4] ss:$16 sps:$4 sm:$0xff]   ;;  %v4381_v53 = vld [vmem:[#allocation7 + $0x440] ss:$16 sps:$4 sm:$0xff]  }
 0x176   :  { %1450 = vmatpush1.bf16.msra.mxu0 %v4273_v24  ;;  %1532 = vmatpush1.bf16.msra.mxu1 %v4276_v25  ;;  %v4348_v24 = vld [vmem:[#allocation7 + $0x388] ss:$16 sps:$4 sm:$0xff]   ;;  %v169_v25 = vrot.slane %v4995_v33, %v4982_v8 }
 0x177   :  { %1451 = vmatprep.subr.bf16.mxu0 %v4281_v27  ;;  %1533 = vmatprep.subr.bf16.mxu1 %v4284_v28  ;;  %v4356_v27 = vld [vmem:[#allocation7 + $0x3ac] ss:$16 sps:$4 sm:$0xff]   ;;  %v4351_v28 = vld [vmem:[#allocation7 + $0x3a0] ss:$16 sps:$4 sm:$0xff]  }
 0x178   :  { %1481 = vmatprep.mubr.bf16.mxu0 %v603_v58  ;;  %1563 = vmatprep.mubr.bf16.mxu1 %v603_v58  ;;  %v4390_v58 = vld [vmem:[#allocation7 + $0x468] ss:$16 sps:$4 sm:$0xff]  }
 0x17a   :  { %1452 = vmatpush1.bf16.msra.mxu0 %v4279_v29  ;;  %1534 = vmatpush1.bf16.msra.mxu1 %v4282_v30  ;;  %v4354_v29 = vld [vmem:[#allocation7 + $0x3a8] ss:$16 sps:$4 sm:$0xff]   ;;  %v189_v30 = vrot.slane %v169_v25, %v4982_v8  ;;  %v4429_v25 = vld [vmem:[#allocation7 + $0x540] ss:$16 sps:$4 sm:$0xff]  }
 0x17b   :  { %1453 = vmatprep.subr.bf16.mxu0 %v4287_v31  ;;  %1535 = vmatprep.subr.bf16.mxu1 %v4290_v32  ;;  %v4359_v31 = vld [vmem:[#allocation7 + $0x3c4] ss:$16 sps:$4 sm:$0xff]   ;;  %v4362_v32 = vld [vmem:[#allocation7 + $0x3cc] ss:$16 sps:$4 sm:$0xff]  }
 0x17e   :  { %1454 = vmatpush1.bf16.msra.mxu0 %v4285_v34  ;;  %1536 = vmatpush1.bf16.msra.mxu1 %v4288_v35  ;;  %v4357_v34 = vld [vmem:[#allocation7 + $0x3c0] ss:$16 sps:$4 sm:$0xff]   ;;  %v4360_v35 = vld [vmem:[#allocation7 + $0x3c8] ss:$16 sps:$4 sm:$0xff]  }
 0x17f   :  { %1455 = vmatprep.subr.bf16.mxu0 %v4293_v36  ;;  %1537 = vmatprep.subr.bf16.mxu1 %v4296_v37  ;;  %v590_v36 = vadd.f32 %v5000_v44, %v189_v30  ;;  %v4365_v37 = vld [vmem:[#allocation7 + $0x3e4] ss:$16 sps:$4 sm:$0xff]   ;;  %v4438_v30 = vld [vmem:[#allocation7 + $0x568] ss:$16 sps:$4 sm:$0xff]  }
 0x180   :  { %v4377_v44 = vld [vmem:[#allocation7 + $0x424] ss:$16 sps:$4 sm:$0xff]  }
 0x182   :  { %1456 = vmatpush1.bf16.msra.mxu0 %v4291_v39  ;;  %1538 = vmatpush1.bf16.msra.mxu1 %v4294_v40  ;;  %v4363_v39 = vld [vmem:[#allocation7 + $0x3e0] ss:$16 sps:$4 sm:$0xff]   ;;  %v4366_v40 = vld [vmem:[#allocation7 + $0x3e8] ss:$16 sps:$4 sm:$0xff]  }
 0x183   :  { %1457 = vmatprep.subr.bf16.mxu0 %v4299_v41  ;;  %1539 = vmatprep.subr.bf16.mxu1 %v4302_v42  ;;  %v598_v41 = vmax.f32 %v590_v36, 0.0  ;;  %v4371_v42 = vld [vmem:[#allocation7 + $0x404] ss:$16 sps:$4 sm:$0xff]  }
 0x184   :  { %v4449_v36 = vld [vmem:[#allocation7 + $0x5a4] ss:$16 sps:$4 sm:$0xff]  }
 0x185   :  { %v602_v47 = vpack.c.bf16 %v598_v41, %v598_v41  ;;  %v4458_v41 = vld [vmem:[#allocation7 + $0x5cc] ss:$16 sps:$4 sm:$0xff]  }
 0x186   :  { %1458 = vmatpush1.bf16.msra.mxu0 %v4297_v45  ;;  %1540 = vmatpush1.bf16.msra.mxu1 %v4300_v46  ;;  %v4369_v45 = vld [vmem:[#allocation7 + $0x400] ss:$16 sps:$4 sm:$0xff]   ;;  %v4372_v46 = vld [vmem:[#allocation7 + $0x408] ss:$16 sps:$4 sm:$0xff]  }
 0x187   :  { %1459 = vmatprep.subr.bf16.mxu0 %v4305_v48  ;;  %1541 = vmatprep.subr.bf16.mxu1 %v4308_v49  ;;  %v4380_v48 = vld [vmem:[#allocation7 + $0x42c] ss:$16 sps:$4 sm:$0xff]   ;;  %v4375_v49 = vld [vmem:[#allocation7 + $0x420] ss:$16 sps:$4 sm:$0xff]  }
 0x18a   :  { %1460 = vmatpush1.bf16.msra.mxu0 %v4303_v54  ;;  %1542 = vmatpush1.bf16.msra.mxu1 %v4306_v55  ;;  %v4384_v54 = vld [vmem:[#allocation7 + $0x448] ss:$16 sps:$4 sm:$0xff]   ;;  %v4389_v55 = vld [vmem:[#allocation7 + $0x464] ss:$16 sps:$4 sm:$0xff]  }
 0x18b   :  { %1461 = vmatprep.subr.bf16.mxu0 %v4311_v56  ;;  %1543 = vmatprep.subr.bf16.mxu1 %v4314_v57  ;;  %v4392_v56 = vld [vmem:[#allocation7 + $0x46c] ss:$16 sps:$4 sm:$0xff]   ;;  %v4387_v57 = vld [vmem:[#allocation7 + $0x460] ss:$16 sps:$4 sm:$0xff]  }
 0x18e   :  { %1462 = vmatpush1.bf16.msra.mxu0 %v4309_v59  ;;  %1544 = vmatpush1.bf16.msra.mxu1 %v4312_v60  ;;  %v4395_v59 = vld [vmem:[#allocation7 + $0x484] ss:$16 sps:$4 sm:$0xff]   ;;  %v4398_v60 = vld [vmem:[#allocation7 + $0x48c] ss:$16 sps:$4 sm:$0xff]  }
 0x18f   :  { %1463 = vmatprep.subr.bf16.mxu0 %v4317_v61  ;;  %1545 = vmatprep.subr.bf16.mxu1 %v4320_v62  ;;  %v4393_v61 = vld [vmem:[#allocation7 + $0x480] ss:$16 sps:$4 sm:$0xff]   ;;  %v4396_v62 = vld [vmem:[#allocation7 + $0x488] ss:$16 sps:$4 sm:$0xff]  }
 0x192   :  { %1464 = vmatpush1.bf16.msra.mxu0 %v4315_v63  ;;  %1546 = vmatpush1.bf16.msra.mxu1 %v4318_v0  ;;  %v4401_v63 = vld [vmem:[#allocation7 + $0x4a4] ss:$16 sps:$4 sm:$0xff]   ;;  %v4404_v0 = vld [vmem:[#allocation7 + $0x4ac] ss:$16 sps:$4 sm:$0xff]  }
 0x193   :  { %1465 = vmatprep.subr.bf16.mxu0 %v4323_v1  ;;  %1547 = vmatprep.subr.bf16.mxu1 %v4326_v2  ;;  %v4399_v1 = vld [vmem:[#allocation7 + $0x4a0] ss:$16 sps:$4 sm:$0xff]   ;;  %v4402_v2 = vld [vmem:[#allocation7 + $0x4a8] ss:$16 sps:$4 sm:$0xff]  }
 0x196   :  { %1466 = vmatpush1.bf16.msra.mxu0 %v4321_v3  ;;  %1548 = vmatpush1.bf16.msra.mxu1 %v4324_v4  ;;  %v4407_v3 = vld [vmem:[#allocation7 + $0x4c4] ss:$16 sps:$4 sm:$0xff]   ;;  %v4410_v4 = vld [vmem:[#allocation7 + $0x4cc] ss:$16 sps:$4 sm:$0xff]  }
 0x197   :  { %1467 = vmatprep.subr.bf16.mxu0 %v4329_v5  ;;  %1549 = vmatprep.subr.bf16.mxu1 %v4332_v6  ;;  %v4405_v5 = vld [vmem:[#allocation7 + $0x4c0] ss:$16 sps:$4 sm:$0xff]   ;;  %v4408_v6 = vld [vmem:[#allocation7 + $0x4c8] ss:$16 sps:$4 sm:$0xff]  }
 0x19a   :  { %1468 = vmatpush1.bf16.msra.mxu0 %v4327_v11  ;;  %1550 = vmatpush1.bf16.msra.mxu1 %v4330_v12  ;;  %v4413_v11 = vld [vmem:[#allocation7 + $0x4e4] ss:$16 sps:$4 sm:$0xff]   ;;  %v4416_v12 = vld [vmem:[#allocation7 + $0x4ec] ss:$16 sps:$4 sm:$0xff]  }
 0x19b   :  { %1469 = vmatprep.subr.bf16.mxu0 %v4335_v13  ;;  %1551 = vmatprep.subr.bf16.mxu1 %v4338_v14  ;;  %v4411_v13 = vld [vmem:[#allocation7 + $0x4e0] ss:$16 sps:$4 sm:$0xff]   ;;  %v4414_v14 = vld [vmem:[#allocation7 + $0x4e8] ss:$16 sps:$4 sm:$0xff]  }
 0x19e   :  { %1470 = vmatpush1.bf16.msra.mxu0 %v4333_v15  ;;  %1552 = vmatpush1.bf16.msra.mxu1 %v4336_v16  ;;  %v4419_v15 = vld [vmem:[#allocation7 + $0x504] ss:$16 sps:$4 sm:$0xff]   ;;  %v4422_v16 = vld [vmem:[#allocation7 + $0x50c] ss:$16 sps:$4 sm:$0xff]  }
 0x19f   :  { %1471 = vmatprep.subr.bf16.mxu0 %v4341_v17  ;;  %1553 = vmatprep.subr.bf16.mxu1 %v4344_v18  ;;  %v4417_v17 = vld [vmem:[#allocation7 + $0x500] ss:$16 sps:$4 sm:$0xff]   ;;  %v4420_v18 = vld [vmem:[#allocation7 + $0x508] ss:$16 sps:$4 sm:$0xff]  }
 0x1a2   :  { %1472 = vmatpush1.bf16.msra.mxu0 %v4339_v19  ;;  %1554 = vmatpush1.bf16.msra.mxu1 %v4342_v20  ;;  %v4425_v19 = vld [vmem:[#allocation7 + $0x524] ss:$16 sps:$4 sm:$0xff]   ;;  %v4428_v20 = vld [vmem:[#allocation7 + $0x52c] ss:$16 sps:$4 sm:$0xff]  }
 0x1a3   :  { %1473 = vmatprep.subr.bf16.mxu0 %v4347_v21  ;;  %1555 = vmatprep.subr.bf16.mxu1 %v4350_v22  ;;  %v4423_v21 = vld [vmem:[#allocation7 + $0x520] ss:$16 sps:$4 sm:$0xff]   ;;  %v4426_v22 = vld [vmem:[#allocation7 + $0x528] ss:$16 sps:$4 sm:$0xff]  }
 0x1a6   :  { %1474 = vmatpush1.bf16.msra.mxu0 %v4345_v23  ;;  %1556 = vmatpush1.bf16.msra.mxu1 %v4348_v24  ;;  %v4431_v23 = vld [vmem:[#allocation7 + $0x544] ss:$16 sps:$4 sm:$0xff]   ;;  %v4434_v24 = vld [vmem:[#allocation7 + $0x54c] ss:$16 sps:$4 sm:$0xff]  }
 0x1a7   :  { %1475 = vmatprep.subr.bf16.mxu0 %v4353_v26  ;;  %1557 = vmatprep.subr.bf16.mxu1 %v4356_v27  ;;  %v4432_v26 = vld [vmem:[#allocation7 + $0x548] ss:$16 sps:$4 sm:$0xff]   ;;  %v4437_v27 = vld [vmem:[#allocation7 + $0x564] ss:$16 sps:$4 sm:$0xff]  }
 0x1aa   :  { %1476 = vmatpush1.bf16.msra.mxu0 %v4351_v28  ;;  %1558 = vmatpush1.bf16.msra.mxu1 %v4354_v29  ;;  %v4440_v28 = vld [vmem:[#allocation7 + $0x56c] ss:$16 sps:$4 sm:$0xff]   ;;  %v4435_v29 = vld [vmem:[#allocation7 + $0x560] ss:$16 sps:$4 sm:$0xff]  }
 0x1ab   :  { %1477 = vmatprep.subr.bf16.mxu0 %v4359_v31  ;;  %1559 = vmatprep.subr.bf16.mxu1 %v4362_v32  ;;  %v4443_v31 = vld [vmem:[#allocation7 + $0x584] ss:$16 sps:$4 sm:$0xff]   ;;  %v4446_v32 = vld [vmem:[#allocation7 + $0x58c] ss:$16 sps:$4 sm:$0xff]  }
 0x1ae   :  { %1478 = vmatpush1.bf16.msra.mxu0 %v4357_v34  ;;  %1560 = vmatpush1.bf16.msra.mxu1 %v4360_v35  ;;  %v4441_v34 = vld [vmem:[#allocation7 + $0x580] ss:$16 sps:$4 sm:$0xff]   ;;  %v4444_v35 = vld [vmem:[#allocation7 + $0x588] ss:$16 sps:$4 sm:$0xff]  }
 0x1af   :  { %1479 = vmatprep.subr.bf16.mxu0 %v4365_v37  ;;  %1561 = vmatprep.subr.bf16.mxu1 %v4368_v38  ;;  %v4452_v37 = vld [vmem:[#allocation7 + $0x5ac] ss:$16 sps:$4 sm:$0xff]   ;;  %v4447_v38 = vld [vmem:[#allocation7 + $0x5a0] ss:$16 sps:$4 sm:$0xff]  }
 0x1b2   :  { %1480 = vmatpush1.bf16.msra.mxu0 %v4363_v39  ;;  %1562 = vmatpush1.bf16.msra.mxu1 %v4366_v40  ;;  %v4450_v39 = vld [vmem:[#allocation7 + $0x5a8] ss:$16 sps:$4 sm:$0xff]   ;;  %v4455_v40 = vld [vmem:[#allocation7 + $0x5c4] ss:$16 sps:$4 sm:$0xff]  }
 0x1b3   :  { %2385 = vmatprep.subr.bf16.mxu0 %v4371_v42  ;;  %2467 = vmatprep.subr.bf16.mxu1 %v4374_v43  ;;  %v4453_v42 = vld [vmem:[#allocation7 + $0x5c0] ss:$16 sps:$4 sm:$0xff]   ;;  %v4456_v43 = vld [vmem:[#allocation7 + $0x5c8] ss:$16 sps:$4 sm:$0xff]  }
 0x1b5   :  { %1482 = vmatmul.mubr.bf16.vlgmr.msra.gmra.mrb[4].mxu0 %v602_v47  ;;  %1564 = vmatmul.mubr.bf16.vlgmr.msra.gmra.mrb[4].mxu1 %v602_v47  ;;  %v4459_v47 = vld [vmem:[#allocation7 + $0x5e0] ss:$16 sps:$4 sm:$0xff]  }
 0x1b6   :  { %2386 = vmatpush1.bf16.msra.mxu0 %v4369_v45  ;;  %2468 = vmatpush1.bf16.msra.mxu1 %v4372_v46  ;;  %v4461_v45 = vld [vmem:[#allocation7 + $0x5e4] ss:$16 sps:$4 sm:$0xff]   ;;  %v4464_v46 = vld [vmem:[#allocation7 + $0x5ec] ss:$16 sps:$4 sm:$0xff]  }
 0x1b7   :  { %2387 = vmatprep.subr.bf16.mxu0 %v4377_v44  ;;  %2469 = vmatprep.subr.bf16.mxu1 %v4380_v48  ;;  %v4462_v44 = vld [vmem:[#allocation7 + $0x5e8] ss:$16 sps:$4 sm:$0xff]   ;;  %v4467_v48 = vld [vmem:[#allocation7 + $0x604] ss:$16 sps:$4 sm:$0xff]  }
 0x1ba   :  { %2388 = vmatpush1.bf16.msra.mxu0 %v4375_v49  ;;  %2470 = vmatpush1.bf16.msra.mxu1 %v4378_v50  ;;  %v4470_v49 = vld [vmem:[#allocation7 + $0x60c] ss:$16 sps:$4 sm:$0xff]   ;;  %v5007_v50 = vsub.s32 1, %v4979_v7 }
 0x1bb   :  { %2389 = vmatprep.subr.bf16.mxu0 %v4383_v51  ;;  %2471 = vmatprep.subr.bf16.mxu1 %v4386_v52  ;;  %v738_v51 = vsub.s32 5, %v4979_v7 }
 0x1bc   :  { %v735_v52 = vrot.slane %v4984_v9, %v5007_v50 }
 0x1be   :  { %2390 = vmatpush1.bf16.msra.mxu0 %v4381_v53  ;;  %2472 = vmatpush1.bf16.msra.mxu1 %v4384_v54  ;;  %v739_v53 = vrot.slane %v4984_v9, %v738_v51  ;;  %v747_v54 = vrot.slane %v4995_v33, %v738_v51  ;;  %v4524_v51 = vld [vmem:[#allocation7 + $0x72c] ss:$16 sps:$4 sm:$0xff]  }
 0x1bf   :  { %2391 = vmatprep.subr.bf16.mxu0 %v4389_v55  ;;  %2473 = vmatprep.subr.bf16.mxu1 %v4392_v56  ;;  %v755_v55 = vrot.slane %v735_v52, %v5007_v50  ;;  %v4519_v52 = vld [vmem:[#allocation7 + $0x720] ss:$16 sps:$4 sm:$0xff]  }
 0x1c0   :  { %v759_v56 = vrot.slane %v739_v53, %v5007_v50  ;;  %v4522_v53 = vld [vmem:[#allocation7 + $0x728] ss:$16 sps:$4 sm:$0xff]  }
 0x1c2   :  { %2392 = vmatpush1.bf16.msra.mxu0 %v4387_v57  ;;  %2474 = vmatpush1.bf16.msra.mxu1 %v4390_v58  ;;  %v767_v57 = vrot.slane %v747_v54, %v5007_v50  ;;  %v4527_v54 = vld [vmem:[#allocation7 + $0x744] ss:$16 sps:$4 sm:$0xff]  }
 0x1c3   :  { %2393 = vmatprep.subr.bf16.mxu0 %v4395_v59  ;;  %2475 = vmatprep.subr.bf16.mxu1 %v4398_v60 }
 0x1c6   :  { %2394 = vmatpush1.bf16.msra.mxu0 %v4393_v61  ;;  %2476 = vmatpush1.bf16.msra.mxu1 %v4396_v62 }
 0x1c7   :  { %2395 = vmatprep.subr.bf16.mxu0 %v4401_v63  ;;  %2477 = vmatprep.subr.bf16.mxu1 %v4404_v0 }
 0x1ca   :  { %2396 = vmatpush1.bf16.msra.mxu0 %v4399_v1  ;;  %2478 = vmatpush1.bf16.msra.mxu1 %v4402_v2 }
 0x1cb   :  { %2397 = vmatprep.subr.bf16.mxu0 %v4407_v3  ;;  %2479 = vmatprep.subr.bf16.mxu1 %v4410_v4 }
 0x1ce   :  { %2398 = vmatpush1.bf16.msra.mxu0 %v4405_v5  ;;  %2480 = vmatpush1.bf16.msra.mxu1 %v4408_v6 }
 0x1cf   :  { %2399 = vmatprep.subr.bf16.mxu0 %v4413_v11  ;;  %2481 = vmatprep.subr.bf16.mxu1 %v4416_v12  ;;  %v4465_v12 = vld [vmem:[#allocation7 + $0x600] ss:$16 sps:$4 sm:$0xff]  }
 0x1d2   :  { %2400 = vmatpush1.bf16.msra.mxu0 %v4411_v13  ;;  %2482 = vmatpush1.bf16.msra.mxu1 %v4414_v14  ;;  %v4468_v13 = vld [vmem:[#allocation7 + $0x608] ss:$16 sps:$4 sm:$0xff]  }
 0x1d3   :  { %2401 = vmatprep.subr.bf16.mxu0 %v4419_v15  ;;  %2483 = vmatprep.subr.bf16.mxu1 %v4422_v16  ;;  %v4473_v15 = vld [vmem:[#allocation7 + $0x624] ss:$16 sps:$4 sm:$0xff]   ;;  %v4476_v16 = vld [vmem:[#allocation7 + $0x62c] ss:$16 sps:$4 sm:$0xff]  }
 0x1d6   :  { %2402 = vmatpush1.bf16.msra.mxu0 %v4417_v17  ;;  %2484 = vmatpush1.bf16.msra.mxu1 %v4420_v18  ;;  %v4471_v18 = vld [vmem:[#allocation7 + $0x620] ss:$16 sps:$4 sm:$0xff]  }
 0x1d7   :  { %2403 = vmatprep.subr.bf16.mxu0 %v4425_v19  ;;  %2485 = vmatprep.subr.bf16.mxu1 %v4428_v20  ;;  %v4474_v19 = vld [vmem:[#allocation7 + $0x628] ss:$16 sps:$4 sm:$0xff]   ;;  %v4479_v20 = vld [vmem:[#allocation7 + $0x644] ss:$16 sps:$4 sm:$0xff]  }
 0x1da   :  { %2404 = vmatpush1.bf16.msra.mxu0 %v4423_v21  ;;  %2486 = vmatpush1.bf16.msra.mxu1 %v4426_v22  ;;  %v4482_v21 = vld [vmem:[#allocation7 + $0x64c] ss:$16 sps:$4 sm:$0xff]   ;;  %v4477_v22 = vld [vmem:[#allocation7 + $0x640] ss:$16 sps:$4 sm:$0xff]  }
 0x1db   :  { %2405 = vmatprep.subr.bf16.mxu0 %v4431_v23  ;;  %2487 = vmatprep.subr.bf16.mxu1 %v4434_v24  ;;  %v4480_v23 = vld [vmem:[#allocation7 + $0x648] ss:$16 sps:$4 sm:$0xff]   ;;  %v4485_v24 = vld [vmem:[#allocation7 + $0x664] ss:$16 sps:$4 sm:$0xff]  }
 0x1de   :  { %2406 = vmatpush1.bf16.msra.mxu0 %v4429_v25  ;;  %2488 = vmatpush1.bf16.msra.mxu1 %v4432_v26  ;;  %v4488_v25 = vld [vmem:[#allocation7 + $0x66c] ss:$16 sps:$4 sm:$0xff]   ;;  %v4483_v26 = vld [vmem:[#allocation7 + $0x660] ss:$16 sps:$4 sm:$0xff]  }
 0x1df   :  { %2407 = vmatprep.subr.bf16.mxu0 %v4437_v27  ;;  %2489 = vmatprep.subr.bf16.mxu1 %v4440_v28  ;;  %v4486_v27 = vld [vmem:[#allocation7 + $0x668] ss:$16 sps:$4 sm:$0xff]   ;;  %v4491_v28 = vld [vmem:[#allocation7 + $0x684] ss:$16 sps:$4 sm:$0xff]  }
 0x1e2   :  { %2408 = vmatpush1.bf16.msra.mxu0 %v4435_v29  ;;  %2490 = vmatpush1.bf16.msra.mxu1 %v4438_v30  ;;  %v4494_v29 = vld [vmem:[#allocation7 + $0x68c] ss:$16 sps:$4 sm:$0xff]   ;;  %v4489_v30 = vld [vmem:[#allocation7 + $0x680] ss:$16 sps:$4 sm:$0xff]  }
 0x1e3   :  { %2409 = vmatprep.subr.bf16.mxu0 %v4443_v31  ;;  %2491 = vmatprep.subr.bf16.mxu1 %v4446_v32  ;;  %v4492_v31 = vld [vmem:[#allocation7 + $0x688] ss:$16 sps:$4 sm:$0xff]   ;;  %v4497_v32 = vld [vmem:[#allocation7 + $0x6a4] ss:$16 sps:$4 sm:$0xff]  }
 0x1e6   :  { %2410 = vmatpush1.bf16.msra.mxu0 %v4441_v34  ;;  %2492 = vmatpush1.bf16.msra.mxu1 %v4444_v35  ;;  %v4500_v34 = vld [vmem:[#allocation7 + $0x6ac] ss:$16 sps:$4 sm:$0xff]   ;;  %v4495_v35 = vld [vmem:[#allocation7 + $0x6a0] ss:$16 sps:$4 sm:$0xff]  }
 0x1e7   :  { %2411 = vmatprep.subr.bf16.mxu0 %v4449_v36  ;;  %2493 = vmatprep.subr.bf16.mxu1 %v4452_v37  ;;  %v4498_v36 = vld [vmem:[#allocation7 + $0x6a8] ss:$16 sps:$4 sm:$0xff]   ;;  %v4503_v37 = vld [vmem:[#allocation7 + $0x6c4] ss:$16 sps:$4 sm:$0xff]  }
 0x1ea   :  { %2412 = vmatpush1.bf16.msra.mxu0 %v4447_v38  ;;  %2494 = vmatpush1.bf16.msra.mxu1 %v4450_v39  ;;  %v4506_v38 = vld [vmem:[#allocation7 + $0x6cc] ss:$16 sps:$4 sm:$0xff]   ;;  %v4501_v39 = vld [vmem:[#allocation7 + $0x6c0] ss:$16 sps:$4 sm:$0xff]  }
 0x1eb   :  { %2413 = vmatprep.subr.bf16.mxu0 %v4455_v40  ;;  %2495 = vmatprep.subr.bf16.mxu1 %v4458_v41  ;;  %v4504_v40 = vld [vmem:[#allocation7 + $0x6c8] ss:$16 sps:$4 sm:$0xff]   ;;  %v4509_v41 = vld [vmem:[#allocation7 + $0x6e4] ss:$16 sps:$4 sm:$0xff]  }
 0x1ee   :  { %2414 = vmatpush1.bf16.msra.mxu0 %v4453_v42  ;;  %2496 = vmatpush1.bf16.msra.mxu1 %v4456_v43  ;;  %v4512_v42 = vld [vmem:[#allocation7 + $0x6ec] ss:$16 sps:$4 sm:$0xff]   ;;  %v4507_v43 = vld [vmem:[#allocation7 + $0x6e0] ss:$16 sps:$4 sm:$0xff]  }
 0x1ef   :  { %2415 = vmatprep.subr.bf16.mxu0 %v4461_v45  ;;  %2497 = vmatprep.subr.bf16.mxu1 %v4464_v46  ;;  %v4510_v45 = vld [vmem:[#allocation7 + $0x6e8] ss:$16 sps:$4 sm:$0xff]   ;;  %v4515_v46 = vld [vmem:[#allocation7 + $0x704] ss:$16 sps:$4 sm:$0xff]  }
 0x1f2   :  { %2416 = vmatpush1.bf16.msra.mxu0 %v4459_v47  ;;  %2498 = vmatpush1.bf16.msra.mxu1 %v4462_v44  ;;  %v4518_v47 = vld [vmem:[#allocation7 + $0x70c] ss:$16 sps:$4 sm:$0xff]   ;;  %v4513_v44 = vld [vmem:[#allocation7 + $0x700] ss:$16 sps:$4 sm:$0xff]  }
 0x1f3   :  { %2426 = vmatprep.subr.bf16.mxu0 %v4467_v48  ;;  %2508 = vmatprep.subr.bf16.mxu1 %v4470_v49  ;;  %v4516_v48 = vld [vmem:[#allocation7 + $0x708] ss:$16 sps:$4 sm:$0xff]   ;;  %v4521_v49 = vld [vmem:[#allocation7 + $0x724] ss:$16 sps:$4 sm:$0xff]  }
 0x288   :  { %v1483_v58 = vpop.f32.mrb[4].mxu0  ;;  %v5017_v59 = vpop.f32.mrb[4].mxu1 }
 0x289   :  { %v4038_v60 = vadd.f32 %v1483_v58, %v755_v55  ;;  %v1485_v61 = vpop.f32.mrb[5].mxu0  ;;  %v1567_v62 = vpop.f32.mrb[5].mxu1  ;;  %v4530_v55 = vld [vmem:[#allocation7 + $0x74c] ss:$16 sps:$4 sm:$0xff]   ;;  %v4533_v58 = vld [vmem:[#allocation7 + $0x764] ss:$16 sps:$4 sm:$0xff]  }
 0x28a   :  { %v4039_v63 = vadd.f32 %v1485_v61, %v759_v56  ;;  %v4041_v0 = vadd.f32 %v1567_v62, %v767_v57  ;;  %v1487_v1 = vpop.f32.mrb[6].mxu0  ;;  %v1569_v2 = vpop.f32.mrb[6].mxu1  ;;  %v4525_v56 = vld [vmem:[#allocation7 + $0x740] ss:$16 sps:$4 sm:$0xff]   ;;  %v4528_v57 = vld [vmem:[#allocation7 + $0x748] ss:$16 sps:$4 sm:$0xff]  }
 0x28b   :  { %v1572_v3 = vmax.f32 %v4038_v60, 0.0  ;;  %v1488_v9 = vpop.f32.mrb[7].mxu0  ;;  %v1570_v4 = vpop.f32.mrb[7].mxu1  ;;  %v4536_v60 = vld [vmem:[#allocation7 + $0x76c] ss:$16 sps:$4 sm:$0xff]  }
 0x28c   :  { %v1573_v5 = vmax.f32 %v4039_v63, 0.0  ;;  %v1575_v6 = vmax.f32 %v4041_v0, 0.0  ;;  %v4531_v61 = vld [vmem:[#allocation7 + $0x760] ss:$16 sps:$4 sm:$0xff]   ;;  %v4534_v62 = vld [vmem:[#allocation7 + $0x768] ss:$16 sps:$4 sm:$0xff]  }
 0x28d   :  { %v1576_v14 = vpack.c.bf16 %v1572_v3, %v1572_v3  ;;  %v4539_v63 = vld [vmem:[#allocation7 + $0x784] ss:$16 sps:$4 sm:$0xff]   ;;  %v4542_v0 = vld [vmem:[#allocation7 + $0x78c] ss:$16 sps:$4 sm:$0xff]   ;;  %v4537_v1 = vld [vmem:[#allocation7 + $0x780] ss:$16 sps:$4 sm:$0xff]   ;;  %v743_v3 = vrot.slane %v4995_v33, %v5007_v50 }
 0x28e   :  { %v1577_v11 = vpack.c.bf16 %v1573_v5, %v1573_v5  ;;  %v1579_v17 = vpack.c.bf16 %v1575_v6, %v1575_v6  ;;  %v4540_v2 = vld [vmem:[#allocation7 + $0x788] ss:$16 sps:$4 sm:$0xff]   ;;  %v4545_v9 = vld [vmem:[#allocation7 + $0x7a4] ss:$16 sps:$4 sm:$0xff]   ;;  %v4548_v4 = vld [vmem:[#allocation7 + $0x7ac] ss:$16 sps:$4 sm:$0xff]  }
 0x28f   :  { %v4543_v5 = vld [vmem:[#allocation7 + $0x7a0] ss:$16 sps:$4 sm:$0xff]   ;;  %v4546_v6 = vld [vmem:[#allocation7 + $0x7a8] ss:$16 sps:$4 sm:$0xff]  }
 0x290   :  { %2417 = vmatprep.mubr.bf16.mxu0 %v1577_v11  ;;  %2499 = vmatprep.mubr.bf16.mxu1 %v1577_v11  ;;  %v763_v11 = vrot.slane %v743_v3, %v5007_v50  ;;  %v4563_v50 = vld [vmem:[#allocation7 + $0x804] ss:$16 sps:$4 sm:$0xff]  }
 0x291   :  { %2418 = vmatmul.mubr.bf16.vlgmr.msra.gmra.mrb[8].mxu0 %v1576_v14  ;;  %2500 = vmatmul.mubr.bf16.vlgmr.msra.gmra.mrb[8].mxu1 %v1576_v14  ;;  %v4549_v14 = vld [vmem:[#allocation7 + $0x7c0] ss:$16 sps:$4 sm:$0xff]   ;;  %v4629_v3 = vld [vmem:[#allocation7 + $0x964] ss:$16 sps:$4 sm:$0xff]  }
 0x292   :  { %2427 = vmatpush1.bf16.msra.mxu0 %v4465_v12  ;;  %2509 = vmatpush1.bf16.msra.mxu1 %v4468_v13  ;;  %v4551_v12 = vld [vmem:[#allocation7 + $0x7c4] ss:$16 sps:$4 sm:$0xff]   ;;  %v4554_v13 = vld [vmem:[#allocation7 + $0x7cc] ss:$16 sps:$4 sm:$0xff]   ;;  %v4040_v33 = vadd.f32 %v5017_v59, %v763_v11 }
 0x293   :  { %2458 = vmatprep.mubr.bf16.mxu0 %v1579_v17  ;;  %2540 = vmatprep.mubr.bf16.mxu1 %v1579_v17  ;;  %v4560_v17 = vld [vmem:[#allocation7 + $0x7ec] ss:$16 sps:$4 sm:$0xff]   ;;  %v4569_v59 = vld [vmem:[#allocation7 + $0x824] ss:$16 sps:$4 sm:$0xff]  }
 0x294   :  { %2428 = vmatprep.subr.bf16.mxu0 %v4473_v15  ;;  %2510 = vmatprep.subr.bf16.mxu1 %v4476_v16  ;;  %v4552_v15 = vld [vmem:[#allocation7 + $0x7c8] ss:$16 sps:$4 sm:$0xff]   ;;  %v4557_v16 = vld [vmem:[#allocation7 + $0x7e4] ss:$16 sps:$4 sm:$0xff]   ;;  %v4638_v11 = vld [vmem:[#allocation7 + $0x98c] ss:$16 sps:$4 sm:$0xff]  }
 0x296   :  { %2429 = vmatpush1.bf16.msra.mxu0 %v4471_v18  ;;  %2511 = vmatpush1.bf16.msra.mxu1 %v4474_v19  ;;  %v4555_v18 = vld [vmem:[#allocation7 + $0x7e0] ss:$16 sps:$4 sm:$0xff]   ;;  %v4558_v19 = vld [vmem:[#allocation7 + $0x7e8] ss:$16 sps:$4 sm:$0xff]  }
 0x297   :  { %2430 = vmatprep.subr.bf16.mxu0 %v4479_v20  ;;  %2512 = vmatprep.subr.bf16.mxu1 %v4482_v21  ;;  %v1574_v20 = vmax.f32 %v4040_v33, 0.0  ;;  %v4566_v21 = vld [vmem:[#allocation7 + $0x80c] ss:$16 sps:$4 sm:$0xff]   ;;  %v4639_v33 = vld [vmem:[#allocation7 + $0x9a0] ss:$16 sps:$4 sm:$0xff]  }
 0x29a   :  { %2431 = vmatpush1.bf16.msra.mxu0 %v4477_v22  ;;  %2513 = vmatpush1.bf16.msra.mxu1 %v4480_v23  ;;  %v4561_v22 = vld [vmem:[#allocation7 + $0x800] ss:$16 sps:$4 sm:$0xff]   ;;  %v4564_v23 = vld [vmem:[#allocation7 + $0x808] ss:$16 sps:$4 sm:$0xff]  }
 0x29b   :  { %2432 = vmatprep.subr.bf16.mxu0 %v4485_v24  ;;  %2514 = vmatprep.subr.bf16.mxu1 %v4488_v25  ;;  %v1578_v24 = vpack.c.bf16 %v1574_v20, %v1574_v20  ;;  %v4572_v25 = vld [vmem:[#allocation7 + $0x82c] ss:$16 sps:$4 sm:$0xff]   ;;  %v4648_v20 = vld [vmem:[#allocation7 + $0x9c8] ss:$16 sps:$4 sm:$0xff]  }
 0x29e   :  { %2433 = vmatpush1.bf16.msra.mxu0 %v4483_v26  ;;  %2515 = vmatpush1.bf16.msra.mxu1 %v4486_v27  ;;  %v4567_v26 = vld [vmem:[#allocation7 + $0x820] ss:$16 sps:$4 sm:$0xff]   ;;  %v4570_v27 = vld [vmem:[#allocation7 + $0x828] ss:$16 sps:$4 sm:$0xff]  }
 0x29f   :  { %2434 = vmatprep.subr.bf16.mxu0 %v4491_v28  ;;  %2516 = vmatprep.subr.bf16.mxu1 %v4494_v29  ;;  %v4575_v28 = vld [vmem:[#allocation7 + $0x844] ss:$16 sps:$4 sm:$0xff]   ;;  %v4578_v29 = vld [vmem:[#allocation7 + $0x84c] ss:$16 sps:$4 sm:$0xff]  }
 0x2a2   :  { %2435 = vmatpush1.bf16.msra.mxu0 %v4489_v30  ;;  %2517 = vmatpush1.bf16.msra.mxu1 %v4492_v31  ;;  %v4573_v30 = vld [vmem:[#allocation7 + $0x840] ss:$16 sps:$4 sm:$0xff]   ;;  %v4576_v31 = vld [vmem:[#allocation7 + $0x848] ss:$16 sps:$4 sm:$0xff]  }
 0x2a3   :  { %2436 = vmatprep.subr.bf16.mxu0 %v4497_v32  ;;  %2518 = vmatprep.subr.bf16.mxu1 %v4500_v34  ;;  %v4581_v32 = vld [vmem:[#allocation7 + $0x864] ss:$16 sps:$4 sm:$0xff]   ;;  %v4584_v34 = vld [vmem:[#allocation7 + $0x86c] ss:$16 sps:$4 sm:$0xff]  }
 0x2a6   :  { %2437 = vmatpush1.bf16.msra.mxu0 %v4495_v35  ;;  %2519 = vmatpush1.bf16.msra.mxu1 %v4498_v36  ;;  %v4579_v35 = vld [vmem:[#allocation7 + $0x860] ss:$16 sps:$4 sm:$0xff]   ;;  %v4582_v36 = vld [vmem:[#allocation7 + $0x868] ss:$16 sps:$4 sm:$0xff]  }
 0x2a7   :  { %2438 = vmatprep.subr.bf16.mxu0 %v4503_v37  ;;  %2520 = vmatprep.subr.bf16.mxu1 %v4506_v38  ;;  %v4587_v37 = vld [vmem:[#allocation7 + $0x884] ss:$16 sps:$4 sm:$0xff]   ;;  %v4590_v38 = vld [vmem:[#allocation7 + $0x88c] ss:$16 sps:$4 sm:$0xff]  }
 0x2aa   :  { %2439 = vmatpush1.bf16.msra.mxu0 %v4501_v39  ;;  %2521 = vmatpush1.bf16.msra.mxu1 %v4504_v40  ;;  %v4585_v39 = vld [vmem:[#allocation7 + $0x880] ss:$16 sps:$4 sm:$0xff]   ;;  %v4588_v40 = vld [vmem:[#allocation7 + $0x888] ss:$16 sps:$4 sm:$0xff]  }
 0x2ab   :  { %2440 = vmatprep.subr.bf16.mxu0 %v4509_v41  ;;  %2522 = vmatprep.subr.bf16.mxu1 %v4512_v42  ;;  %v4593_v41 = vld [vmem:[#allocation7 + $0x8a4] ss:$16 sps:$4 sm:$0xff]   ;;  %v4596_v42 = vld [vmem:[#allocation7 + $0x8ac] ss:$16 sps:$4 sm:$0xff]  }
 0x2ae   :  { %2441 = vmatpush1.bf16.msra.mxu0 %v4507_v43  ;;  %2523 = vmatpush1.bf16.msra.mxu1 %v4510_v45  ;;  %v4591_v43 = vld [vmem:[#allocation7 + $0x8a0] ss:$16 sps:$4 sm:$0xff]   ;;  %v4594_v45 = vld [vmem:[#allocation7 + $0x8a8] ss:$16 sps:$4 sm:$0xff]  }
 0x2af   :  { %2442 = vmatprep.subr.bf16.mxu0 %v4515_v46  ;;  %2524 = vmatprep.subr.bf16.mxu1 %v4518_v47  ;;  %v4599_v46 = vld [vmem:[#allocation7 + $0x8c4] ss:$16 sps:$4 sm:$0xff]   ;;  %v4602_v47 = vld [vmem:[#allocation7 + $0x8cc] ss:$16 sps:$4 sm:$0xff]  }
 0x2b2   :  { %2443 = vmatpush1.bf16.msra.mxu0 %v4513_v44  ;;  %2525 = vmatpush1.bf16.msra.mxu1 %v4516_v48  ;;  %v4597_v44 = vld [vmem:[#allocation7 + $0x8c0] ss:$16 sps:$4 sm:$0xff]   ;;  %v4600_v48 = vld [vmem:[#allocation7 + $0x8c8] ss:$16 sps:$4 sm:$0xff]  }
 0x2b3   :  { %2444 = vmatprep.subr.bf16.mxu0 %v4521_v49  ;;  %2526 = vmatprep.subr.bf16.mxu1 %v4524_v51  ;;  %v4605_v49 = vld [vmem:[#allocation7 + $0x8e4] ss:$16 sps:$4 sm:$0xff]   ;;  %v4608_v51 = vld [vmem:[#allocation7 + $0x8ec] ss:$16 sps:$4 sm:$0xff]  }
 0x2b6   :  { %2445 = vmatpush1.bf16.msra.mxu0 %v4519_v52  ;;  %2527 = vmatpush1.bf16.msra.mxu1 %v4522_v53  ;;  %v4603_v52 = vld [vmem:[#allocation7 + $0x8e0] ss:$16 sps:$4 sm:$0xff]   ;;  %v4606_v53 = vld [vmem:[#allocation7 + $0x8e8] ss:$16 sps:$4 sm:$0xff]  }
 0x2b7   :  { %2446 = vmatprep.subr.bf16.mxu0 %v4527_v54  ;;  %2528 = vmatprep.subr.bf16.mxu1 %v4530_v55  ;;  %v4611_v54 = vld [vmem:[#allocation7 + $0x904] ss:$16 sps:$4 sm:$0xff]   ;;  %v4614_v55 = vld [vmem:[#allocation7 + $0x90c] ss:$16 sps:$4 sm:$0xff]  }
 0x2ba   :  { %2447 = vmatpush1.bf16.msra.mxu0 %v4525_v56  ;;  %2529 = vmatpush1.bf16.msra.mxu1 %v4528_v57  ;;  %v4609_v56 = vld [vmem:[#allocation7 + $0x900] ss:$16 sps:$4 sm:$0xff]   ;;  %v4612_v57 = vld [vmem:[#allocation7 + $0x908] ss:$16 sps:$4 sm:$0xff]  }
 0x2bb   :  { %2448 = vmatprep.subr.bf16.mxu0 %v4533_v58  ;;  %2530 = vmatprep.subr.bf16.mxu1 %v4536_v60  ;;  %v4617_v58 = vld [vmem:[#allocation7 + $0x924] ss:$16 sps:$4 sm:$0xff]   ;;  %v4620_v60 = vld [vmem:[#allocation7 + $0x92c] ss:$16 sps:$4 sm:$0xff]  }
 0x2be   :  { %2449 = vmatpush1.bf16.msra.mxu0 %v4531_v61  ;;  %2531 = vmatpush1.bf16.msra.mxu1 %v4534_v62  ;;  %v4615_v61 = vld [vmem:[#allocation7 + $0x920] ss:$16 sps:$4 sm:$0xff]   ;;  %v4618_v62 = vld [vmem:[#allocation7 + $0x928] ss:$16 sps:$4 sm:$0xff]  }
 0x2bf   :  { %2450 = vmatprep.subr.bf16.mxu0 %v4539_v63  ;;  %2532 = vmatprep.subr.bf16.mxu1 %v4542_v0  ;;  %v4623_v63 = vld [vmem:[#allocation7 + $0x944] ss:$16 sps:$4 sm:$0xff]   ;;  %v4626_v0 = vld [vmem:[#allocation7 + $0x94c] ss:$16 sps:$4 sm:$0xff]  }
 0x2c2   :  { %2451 = vmatpush1.bf16.msra.mxu0 %v4537_v1  ;;  %2533 = vmatpush1.bf16.msra.mxu1 %v4540_v2  ;;  %v4621_v1 = vld [vmem:[#allocation7 + $0x940] ss:$16 sps:$4 sm:$0xff]   ;;  %v4624_v2 = vld [vmem:[#allocation7 + $0x948] ss:$16 sps:$4 sm:$0xff]  }
 0x2c3   :  { %2452 = vmatprep.subr.bf16.mxu0 %v4545_v9  ;;  %2534 = vmatprep.subr.bf16.mxu1 %v4548_v4  ;;  %v4632_v9 = vld [vmem:[#allocation7 + $0x96c] ss:$16 sps:$4 sm:$0xff]   ;;  %v4627_v4 = vld [vmem:[#allocation7 + $0x960] ss:$16 sps:$4 sm:$0xff]  }
 0x2c6   :  { %2453 = vmatpush1.bf16.msra.mxu0 %v4543_v5  ;;  %2535 = vmatpush1.bf16.msra.mxu1 %v4546_v6  ;;  %v4630_v5 = vld [vmem:[#allocation7 + $0x968] ss:$16 sps:$4 sm:$0xff]   ;;  %v4635_v6 = vld [vmem:[#allocation7 + $0x984] ss:$16 sps:$4 sm:$0xff]  }
 0x2c7   :  { %2454 = vmatprep.subr.bf16.mxu0 %v4551_v12  ;;  %2536 = vmatprep.subr.bf16.mxu1 %v4554_v13  ;;  %v4633_v12 = vld [vmem:[#allocation7 + $0x980] ss:$16 sps:$4 sm:$0xff]   ;;  %v4636_v13 = vld [vmem:[#allocation7 + $0x988] ss:$16 sps:$4 sm:$0xff]  }
 0x2ca   :  { %2455 = vmatpush1.bf16.msra.mxu0 %v4549_v14  ;;  %2537 = vmatpush1.bf16.msra.mxu1 %v4552_v15  ;;  %v4641_v14 = vld [vmem:[#allocation7 + $0x9a4] ss:$16 sps:$4 sm:$0xff]   ;;  %v4644_v15 = vld [vmem:[#allocation7 + $0x9ac] ss:$16 sps:$4 sm:$0xff]  }
 0x2cb   :  { %2456 = vmatprep.subr.bf16.mxu0 %v4557_v16  ;;  %2538 = vmatprep.subr.bf16.mxu1 %v4560_v17  ;;  %v4642_v16 = vld [vmem:[#allocation7 + $0x9a8] ss:$16 sps:$4 sm:$0xff]   ;;  %v4647_v17 = vld [vmem:[#allocation7 + $0x9c4] ss:$16 sps:$4 sm:$0xff]  }
 0x2ce   :  { %2457 = vmatpush1.bf16.msra.mxu0 %v4555_v18  ;;  %2539 = vmatpush1.bf16.msra.mxu1 %v4558_v19  ;;  %v4650_v18 = vld [vmem:[#allocation7 + $0x9cc] ss:$16 sps:$4 sm:$0xff]   ;;  %v4645_v19 = vld [vmem:[#allocation7 + $0x9c0] ss:$16 sps:$4 sm:$0xff]  }
 0x2cf   :  { %3362 = vmatprep.subr.bf16.mxu0 %v4563_v50  ;;  %3444 = vmatprep.subr.bf16.mxu1 %v4566_v21  ;;  %v4653_v50 = vld [vmem:[#allocation7 + $0x9e4] ss:$16 sps:$4 sm:$0xff]   ;;  %v4656_v21 = vld [vmem:[#allocation7 + $0x9ec] ss:$16 sps:$4 sm:$0xff]  }
 0x2d1   :  { %2459 = vmatmul.mubr.bf16.vlgmr.msra.gmra.mrb[8].mxu0 %v1578_v24  ;;  %2541 = vmatmul.mubr.bf16.vlgmr.msra.gmra.mrb[8].mxu1 %v1578_v24  ;;  %v4659_v24 = vld [vmem:[#allocation7 + $0xa04] ss:$16 sps:$4 sm:$0xff]  }
 0x2d2   :  { %3363 = vmatpush1.bf16.msra.mxu0 %v4561_v22  ;;  %3445 = vmatpush1.bf16.msra.mxu1 %v4564_v23  ;;  %v4651_v22 = vld [vmem:[#allocation7 + $0x9e0] ss:$16 sps:$4 sm:$0xff]   ;;  %v4654_v23 = vld [vmem:[#allocation7 + $0x9e8] ss:$16 sps:$4 sm:$0xff]  }
 0x2d3   :  { %3364 = vmatprep.subr.bf16.mxu0 %v4569_v59  ;;  %3446 = vmatprep.subr.bf16.mxu1 %v4572_v25  ;;  %v4662_v59 = vld [vmem:[#allocation7 + $0xa0c] ss:$16 sps:$4 sm:$0xff]   ;;  %v5024_v25 = vsub.s32 2, %v4979_v7 }
 0x2d6   :  { %3365 = vmatpush1.bf16.msra.mxu0 %v4567_v26  ;;  %3447 = vmatpush1.bf16.msra.mxu1 %v4570_v27  ;;  %v5027_v26 = vsub.s32 6, %v4979_v7  ;;  %v5029_v27 = vld [vmem:[#allocation8] sm:$0xff] }
 0x2d7   :  { %3366 = vmatprep.subr.bf16.mxu0 %v4575_v28  ;;  %3448 = vmatprep.subr.bf16.mxu1 %v4578_v29  ;;  %v1712_v28 = vrot.slane %v5029_v27, %v5024_v25 }
 0x2d8   :  { %v1716_v29 = vrot.slane %v5029_v27, %v5027_v26 }
 0x2da   :  { %3367 = vmatpush1.bf16.msra.mxu0 %v4573_v30  ;;  %3449 = vmatpush1.bf16.msra.mxu1 %v4576_v31  ;;  %v5035_v30 = vld [vmem:[#allocation8 + $0x8] sm:$0xff] }
 0x2db   :  { %3368 = vmatprep.subr.bf16.mxu0 %v4581_v32  ;;  %3450 = vmatprep.subr.bf16.mxu1 %v4584_v34  ;;  %v1724_v31 = vrot.slane %v5035_v30, %v5027_v26  ;;  %v1732_v32 = vrot.slane %v1712_v28, %v5024_v25  ;;  %v1736_v34 = vrot.slane %v1716_v29, %v5024_v25  ;;  %v4713_v28 = vld [vmem:[#allocation7 + $0xb24] ss:$16 sps:$4 sm:$0xff]   ;;  %v4716_v29 = vld [vmem:[#allocation7 + $0xb2c] ss:$16 sps:$4 sm:$0xff]  }
 0x2de   :  { %3369 = vmatpush1.bf16.msra.mxu0 %v4579_v35  ;;  %3451 = vmatpush1.bf16.msra.mxu1 %v4582_v36  ;;  %v1744_v35 = vrot.slane %v1724_v31, %v5024_v25  ;;  %v4711_v31 = vld [vmem:[#allocation7 + $0xb20] ss:$16 sps:$4 sm:$0xff]  }
 0x2df   :  { %3370 = vmatprep.subr.bf16.mxu0 %v4587_v37  ;;  %3452 = vmatprep.subr.bf16.mxu1 %v4590_v38 }
 0x2e2   :  { %3371 = vmatpush1.bf16.msra.mxu0 %v4585_v39  ;;  %3453 = vmatpush1.bf16.msra.mxu1 %v4588_v40 }
 0x2e3   :  { %3372 = vmatprep.subr.bf16.mxu0 %v4593_v41  ;;  %3454 = vmatprep.subr.bf16.mxu1 %v4596_v42 }
 0x2e6   :  { %3373 = vmatpush1.bf16.msra.mxu0 %v4591_v43  ;;  %3455 = vmatpush1.bf16.msra.mxu1 %v4594_v45 }
 0x2e7   :  { %3374 = vmatprep.subr.bf16.mxu0 %v4599_v46  ;;  %3456 = vmatprep.subr.bf16.mxu1 %v4602_v47 }
 0x2ea   :  { %3375 = vmatpush1.bf16.msra.mxu0 %v4597_v44  ;;  %3457 = vmatpush1.bf16.msra.mxu1 %v4600_v48 }
 0x2eb   :  { %3376 = vmatprep.subr.bf16.mxu0 %v4605_v49  ;;  %3458 = vmatprep.subr.bf16.mxu1 %v4608_v51 }
 0x2ee   :  { %3377 = vmatpush1.bf16.msra.mxu0 %v4603_v52  ;;  %3459 = vmatpush1.bf16.msra.mxu1 %v4606_v53  ;;  %v4657_v52 = vld [vmem:[#allocation7 + $0xa00] ss:$16 sps:$4 sm:$0xff]   ;;  %v4660_v53 = vld [vmem:[#allocation7 + $0xa08] ss:$16 sps:$4 sm:$0xff]  }
 0x2ef   :  { %3378 = vmatprep.subr.bf16.mxu0 %v4611_v54  ;;  %3460 = vmatprep.subr.bf16.mxu1 %v4614_v55  ;;  %v4665_v55 = vld [vmem:[#allocation7 + $0xa24] ss:$16 sps:$4 sm:$0xff]  }
 0x2f2   :  { %3379 = vmatpush1.bf16.msra.mxu0 %v4609_v56  ;;  %3461 = vmatpush1.bf16.msra.mxu1 %v4612_v57  ;;  %v4668_v56 = vld [vmem:[#allocation7 + $0xa2c] ss:$16 sps:$4 sm:$0xff]  }
 0x2f3   :  { %3380 = vmatprep.subr.bf16.mxu0 %v4617_v58  ;;  %3462 = vmatprep.subr.bf16.mxu1 %v4620_v60  ;;  %v4663_v58 = vld [vmem:[#allocation7 + $0xa20] ss:$16 sps:$4 sm:$0xff]   ;;  %v4666_v60 = vld [vmem:[#allocation7 + $0xa28] ss:$16 sps:$4 sm:$0xff]  }
 0x2f6   :  { %3381 = vmatpush1.bf16.msra.mxu0 %v4615_v61  ;;  %3463 = vmatpush1.bf16.msra.mxu1 %v4618_v62  ;;  %v4671_v61 = vld [vmem:[#allocation7 + $0xa44] ss:$16 sps:$4 sm:$0xff]   ;;  %v4674_v62 = vld [vmem:[#allocation7 + $0xa4c] ss:$16 sps:$4 sm:$0xff]  }
 0x2f7   :  { %3382 = vmatprep.subr.bf16.mxu0 %v4623_v63  ;;  %3464 = vmatprep.subr.bf16.mxu1 %v4626_v0  ;;  %v4669_v63 = vld [vmem:[#allocation7 + $0xa40] ss:$16 sps:$4 sm:$0xff]   ;;  %v4672_v0 = vld [vmem:[#allocation7 + $0xa48] ss:$16 sps:$4 sm:$0xff]  }
 0x2fa   :  { %3383 = vmatpush1.bf16.msra.mxu0 %v4621_v1  ;;  %3465 = vmatpush1.bf16.msra.mxu1 %v4624_v2  ;;  %v4677_v1 = vld [vmem:[#allocation7 + $0xa64] ss:$16 sps:$4 sm:$0xff]   ;;  %v4680_v2 = vld [vmem:[#allocation7 + $0xa6c] ss:$16 sps:$4 sm:$0xff]  }
 0x2fb   :  { %3384 = vmatprep.subr.bf16.mxu0 %v4629_v3  ;;  %3466 = vmatprep.subr.bf16.mxu1 %v4632_v9  ;;  %v4675_v3 = vld [vmem:[#allocation7 + $0xa60] ss:$16 sps:$4 sm:$0xff]   ;;  %v4678_v9 = vld [vmem:[#allocation7 + $0xa68] ss:$16 sps:$4 sm:$0xff]  }
 0x2fe   :  { %3385 = vmatpush1.bf16.msra.mxu0 %v4627_v4  ;;  %3467 = vmatpush1.bf16.msra.mxu1 %v4630_v5  ;;  %v4683_v4 = vld [vmem:[#allocation7 + $0xa84] ss:$16 sps:$4 sm:$0xff]   ;;  %v4686_v5 = vld [vmem:[#allocation7 + $0xa8c] ss:$16 sps:$4 sm:$0xff]  }
 0x2ff   :  { %3386 = vmatprep.subr.bf16.mxu0 %v4635_v6  ;;  %3468 = vmatprep.subr.bf16.mxu1 %v4638_v11  ;;  %v4681_v6 = vld [vmem:[#allocation7 + $0xa80] ss:$16 sps:$4 sm:$0xff]   ;;  %v4684_v11 = vld [vmem:[#allocation7 + $0xa88] ss:$16 sps:$4 sm:$0xff]  }
 0x302   :  { %3387 = vmatpush1.bf16.msra.mxu0 %v4633_v12  ;;  %3469 = vmatpush1.bf16.msra.mxu1 %v4636_v13  ;;  %v4689_v12 = vld [vmem:[#allocation7 + $0xaa4] ss:$16 sps:$4 sm:$0xff]   ;;  %v4692_v13 = vld [vmem:[#allocation7 + $0xaac] ss:$16 sps:$4 sm:$0xff]  }
 0x303   :  { %3388 = vmatprep.subr.bf16.mxu0 %v4641_v14  ;;  %3470 = vmatprep.subr.bf16.mxu1 %v4644_v15  ;;  %v4687_v14 = vld [vmem:[#allocation7 + $0xaa0] ss:$16 sps:$4 sm:$0xff]   ;;  %v4690_v15 = vld [vmem:[#allocation7 + $0xaa8] ss:$16 sps:$4 sm:$0xff]  }
 0x306   :  { %3389 = vmatpush1.bf16.msra.mxu0 %v4639_v33  ;;  %3471 = vmatpush1.bf16.msra.mxu1 %v4642_v16  ;;  %v4695_v33 = vld [vmem:[#allocation7 + $0xac4] ss:$16 sps:$4 sm:$0xff]   ;;  %v4698_v16 = vld [vmem:[#allocation7 + $0xacc] ss:$16 sps:$4 sm:$0xff]  }
 0x307   :  { %3390 = vmatprep.subr.bf16.mxu0 %v4647_v17  ;;  %3472 = vmatprep.subr.bf16.mxu1 %v4650_v18  ;;  %v4693_v17 = vld [vmem:[#allocation7 + $0xac0] ss:$16 sps:$4 sm:$0xff]   ;;  %v4696_v18 = vld [vmem:[#allocation7 + $0xac8] ss:$16 sps:$4 sm:$0xff]  }
 0x30a   :  { %3391 = vmatpush1.bf16.msra.mxu0 %v4645_v19  ;;  %3473 = vmatpush1.bf16.msra.mxu1 %v4648_v20  ;;  %v4701_v19 = vld [vmem:[#allocation7 + $0xae4] ss:$16 sps:$4 sm:$0xff]   ;;  %v4704_v20 = vld [vmem:[#allocation7 + $0xaec] ss:$16 sps:$4 sm:$0xff]  }
 0x30b   :  { %3392 = vmatprep.subr.bf16.mxu0 %v4653_v50  ;;  %3474 = vmatprep.subr.bf16.mxu1 %v4656_v21  ;;  %v4699_v50 = vld [vmem:[#allocation7 + $0xae0] ss:$16 sps:$4 sm:$0xff]   ;;  %v4702_v21 = vld [vmem:[#allocation7 + $0xae8] ss:$16 sps:$4 sm:$0xff]  }
 0x30e   :  { %3393 = vmatpush1.bf16.msra.mxu0 %v4651_v22  ;;  %3475 = vmatpush1.bf16.msra.mxu1 %v4654_v23  ;;  %v4707_v22 = vld [vmem:[#allocation7 + $0xb04] ss:$16 sps:$4 sm:$0xff]   ;;  %v4710_v23 = vld [vmem:[#allocation7 + $0xb0c] ss:$16 sps:$4 sm:$0xff]  }
 0x30f   :  { %3403 = vmatprep.subr.bf16.mxu0 %v4659_v24  ;;  %3485 = vmatprep.subr.bf16.mxu1 %v4662_v59  ;;  %v4705_v24 = vld [vmem:[#allocation7 + $0xb00] ss:$16 sps:$4 sm:$0xff]   ;;  %v4708_v59 = vld [vmem:[#allocation7 + $0xb08] ss:$16 sps:$4 sm:$0xff]  }
 0x3a4   :  { %v2460_v36 = vpop.f32.mrb[8].mxu0  ;;  %v5042_v37 = vpop.f32.mrb[8].mxu1 }
 0x3a5   :  { %v4042_v38 = vadd.f32 %v2460_v36, %v1732_v32  ;;  %v2462_v39 = vpop.f32.mrb[9].mxu0  ;;  %v2544_v40 = vpop.f32.mrb[9].mxu1  ;;  %v4714_v32 = vld [vmem:[#allocation7 + $0xb28] ss:$16 sps:$4 sm:$0xff]   ;;  %v4717_v36 = vld [vmem:[#allocation7 + $0xb40] ss:$16 sps:$4 sm:$0xff]  }
 0x3a6   :  { %v4043_v41 = vadd.f32 %v2462_v39, %v1736_v34  ;;  %v4045_v42 = vadd.f32 %v2544_v40, %v1744_v35  ;;  %v2464_v43 = vpop.f32.mrb[10].mxu0  ;;  %v2546_v45 = vpop.f32.mrb[10].mxu1  ;;  %v4719_v34 = vld [vmem:[#allocation7 + $0xb44] ss:$16 sps:$4 sm:$0xff]   ;;  %v4722_v35 = vld [vmem:[#allocation7 + $0xb4c] ss:$16 sps:$4 sm:$0xff]  }
 0x3a7   :  { %v2549_v46 = vmax.f32 %v4042_v38, 0.0  ;;  %v2465_v47 = vpop.f32.mrb[11].mxu0  ;;  %v2547_v44 = vpop.f32.mrb[11].mxu1  ;;  %v4720_v38 = vld [vmem:[#allocation7 + $0xb48] ss:$16 sps:$4 sm:$0xff]  }
 0x3a8   :  { %v2550_v48 = vmax.f32 %v4043_v41, 0.0  ;;  %v2552_v49 = vmax.f32 %v4045_v42, 0.0  ;;  %v4725_v39 = vld [vmem:[#allocation7 + $0xb64] ss:$16 sps:$4 sm:$0xff]   ;;  %v4728_v40 = vld [vmem:[#allocation7 + $0xb6c] ss:$16 sps:$4 sm:$0xff]   ;;  %v1720_v44 = vrot.slane %v5035_v30, %v5024_v25 }
 0x3a9   :  { %v2553_v54 = vpack.c.bf16 %v2549_v46, %v2549_v46  ;;  %v4723_v41 = vld [vmem:[#allocation7 + $0xb60] ss:$16 sps:$4 sm:$0xff]   ;;  %v4726_v42 = vld [vmem:[#allocation7 + $0xb68] ss:$16 sps:$4 sm:$0xff]   ;;  %v4731_v43 = vld [vmem:[#allocation7 + $0xb84] ss:$16 sps:$4 sm:$0xff]  }
 0x3aa   :  { %v2554_v51 = vpack.c.bf16 %v2550_v48, %v2550_v48  ;;  %v2556_v57 = vpack.c.bf16 %v2552_v49, %v2552_v49  ;;  %v4734_v45 = vld [vmem:[#allocation7 + $0xb8c] ss:$16 sps:$4 sm:$0xff]   ;;  %v4729_v46 = vld [vmem:[#allocation7 + $0xb80] ss:$16 sps:$4 sm:$0xff]   ;;  %v4732_v47 = vld [vmem:[#allocation7 + $0xb88] ss:$16 sps:$4 sm:$0xff]  }
 0x3ab   :  { %v4737_v48 = vld [vmem:[#allocation7 + $0xba4] ss:$16 sps:$4 sm:$0xff]   ;;  %v4740_v49 = vld [vmem:[#allocation7 + $0xbac] ss:$16 sps:$4 sm:$0xff]  }
 0x3ac   :  { %3394 = vmatprep.mubr.bf16.mxu0 %v2554_v51  ;;  %3476 = vmatprep.mubr.bf16.mxu1 %v2554_v51  ;;  %v4735_v51 = vld [vmem:[#allocation7 + $0xba0] ss:$16 sps:$4 sm:$0xff]  }
 0x3ad   :  { %3395 = vmatmul.mubr.bf16.vlgmr.msra.gmra.mrb[12].mxu0 %v2553_v54  ;;  %3477 = vmatmul.mubr.bf16.vlgmr.msra.gmra.mrb[12].mxu1 %v2553_v54  ;;  %v4743_v54 = vld [vmem:[#allocation7 + $0xbc4] ss:$16 sps:$4 sm:$0xff]  }
 0x3ae   :  { %3404 = vmatpush1.bf16.msra.mxu0 %v4657_v52  ;;  %3486 = vmatpush1.bf16.msra.mxu1 %v4660_v53  ;;  %v4738_v52 = vld [vmem:[#allocation7 + $0xba8] ss:$16 sps:$4 sm:$0xff]   ;;  %v1740_v53 = vrot.slane %v1720_v44, %v5024_v25 }
 0x3af   :  { %3435 = vmatprep.mubr.bf16.mxu0 %v2556_v57  ;;  %3517 = vmatprep.mubr.bf16.mxu1 %v2556_v57  ;;  %v4744_v57 = vld [vmem:[#allocation7 + $0xbc8] ss:$16 sps:$4 sm:$0xff]  }
 0x3b0   :  { %3405 = vmatprep.subr.bf16.mxu0 %v4665_v55  ;;  %3487 = vmatprep.subr.bf16.mxu1 %v4668_v56  ;;  %v4746_v55 = vld [vmem:[#allocation7 + $0xbcc] ss:$16 sps:$4 sm:$0xff]   ;;  %v4741_v56 = vld [vmem:[#allocation7 + $0xbc0] ss:$16 sps:$4 sm:$0xff]  }
 0x3b2   :  { %3406 = vmatpush1.bf16.msra.mxu0 %v4663_v58  ;;  %3488 = vmatpush1.bf16.msra.mxu1 %v4666_v60  ;;  %v4044_v58 = vadd.f32 %v5042_v37, %v1740_v53  ;;  %v4749_v60 = vld [vmem:[#allocation7 + $0xbe4] ss:$16 sps:$4 sm:$0xff]   ;;  %v2692_v37 = vsub.s32 7, %v4979_v7 }
 0x3b3   :  { %3407 = vmatprep.subr.bf16.mxu0 %v4671_v61  ;;  %3489 = vmatprep.subr.bf16.mxu1 %v4674_v62  ;;  %v4752_v61 = vld [vmem:[#allocation7 + $0xbec] ss:$16 sps:$4 sm:$0xff]   ;;  %v4747_v62 = vld [vmem:[#allocation7 + $0xbe0] ss:$16 sps:$4 sm:$0xff]  }
 0x3b6   :  { %3408 = vmatpush1.bf16.msra.mxu0 %v4669_v63  ;;  %3490 = vmatpush1.bf16.msra.mxu1 %v4672_v0  ;;  %v4750_v63 = vld [vmem:[#allocation7 + $0xbe8] ss:$16 sps:$4 sm:$0xff]   ;;  %v2551_v0 = vmax.f32 %v4044_v58, 0.0 }
 0x3b7   :  { %3409 = vmatprep.subr.bf16.mxu0 %v4677_v1  ;;  %3491 = vmatprep.subr.bf16.mxu1 %v4680_v2  ;;  %v2688_v2 = vsub.s32 3, %v4979_v7 }
 0x3b8   :  { %v2555_v1 = vpack.c.bf16 %v2551_v0, %v2551_v0 }
 0x3ba   :  { %3410 = vmatpush1.bf16.msra.mxu0 %v4675_v3  ;;  %3492 = vmatpush1.bf16.msra.mxu1 %v4678_v9  ;;  %v3530_v3 = vld [vmem:[#allocation10] sm:$0xf]  ;;  %v2689_v9 = vrot.slane %v5029_v27, %v2688_v2 }
 0x3bb   :  { %3411 = vmatprep.subr.bf16.mxu0 %v4683_v4  ;;  %3493 = vmatprep.subr.bf16.mxu1 %v4686_v5  ;;  %v3531_v4 = vunpack.c.l.bf16 %v3530_v3  ;;  %v2697_v5 = vrot.slane %v5035_v30, %v2688_v2 }
 0x3bd   :  { %v3544_v7 = vrot.slane %v3531_v4, %v4987_v10 }
 0x3be   :  { %3412 = vmatpush1.bf16.msra.mxu0 %v4681_v6  ;;  %3494 = vmatpush1.bf16.msra.mxu1 %v4684_v11  ;;  %v2693_v6 = vrot.slane %v5029_v27, %v2692_v37  ;;  %v2701_v11 = vrot.slane %v5035_v30, %v2692_v37 }
 0x3bf   :  { %3413 = vmatprep.subr.bf16.mxu0 %v4689_v12  ;;  %3495 = vmatprep.subr.bf16.mxu1 %v4692_v13  ;;  %v2709_v12 = vrot.slane %v2689_v9, %v2688_v2  ;;  %v3536_v13 = vrot.slane %v3531_v4, %v4982_v8  ;;  %v3564_v10 = vrot.slane %v3544_v7, %v4982_v8 }
 0x3c2   :  { %3414 = vmatpush1.bf16.msra.mxu0 %v4687_v14  ;;  %3496 = vmatpush1.bf16.msra.mxu1 %v4690_v15  ;;  %v2717_v14 = vrot.slane %v2697_v5, %v2688_v2  ;;  %v2713_v15 = vrot.slane %v2693_v6, %v2688_v2 }
 0x3c3   :  { %3415 = vmatprep.subr.bf16.mxu0 %v4695_v33  ;;  %3497 = vmatprep.subr.bf16.mxu1 %v4698_v16  ;;  %v3540_v33 = vrot.slane %v3531_v4, %v5024_v25  ;;  %v2721_v16 = vrot.slane %v2701_v11, %v2688_v2 }
 0x3c5   :  { %v3560_v30 = vrot.slane %v3540_v33, %v4982_v8 }
 0x3c6   :  { %3416 = vmatpush1.bf16.msra.mxu0 %v4693_v17  ;;  %3498 = vmatpush1.bf16.msra.mxu1 %v4696_v18 }
 0x3c7   :  { %3417 = vmatprep.subr.bf16.mxu0 %v4701_v19  ;;  %3499 = vmatprep.subr.bf16.mxu1 %v4704_v20  ;;  %v3556_v20 = vrot.slane %v3536_v13, %v4982_v8 }
 0x3ca   :  { %3418 = vmatpush1.bf16.msra.mxu0 %v4699_v50  ;;  %3500 = vmatpush1.bf16.msra.mxu1 %v4702_v21 }
 0x3cb   :  { %3419 = vmatprep.subr.bf16.mxu0 %v4707_v22  ;;  %3501 = vmatprep.subr.bf16.mxu1 %v4710_v23 }
 0x3ce   :  { %3420 = vmatpush1.bf16.msra.mxu0 %v4705_v24  ;;  %3502 = vmatpush1.bf16.msra.mxu1 %v4708_v59 }
 0x3cf   :  { %3421 = vmatprep.subr.bf16.mxu0 %v4713_v28  ;;  %3503 = vmatprep.subr.bf16.mxu1 %v4716_v29  ;;  %v3548_v28 = vrot.slane %v3531_v4, %v5027_v26  ;;  %v3579_v26 = vstv %s5073_s5 }
 0x3d2   :  { %3422 = vmatpush1.bf16.msra.mxu0 %v4711_v31  ;;  %3504 = vmatpush1.bf16.msra.mxu1 %v4714_v32 }
 0x3d3   :  { %3423 = vmatprep.subr.bf16.mxu0 %v4719_v34  ;;  %3505 = vmatprep.subr.bf16.mxu1 %v4722_v35 }
 0x3d6   :  { %3424 = vmatpush1.bf16.msra.mxu0 %v4717_v36  ;;  %3506 = vmatpush1.bf16.msra.mxu1 %v4720_v38 }
 0x3d7   :  { %3425 = vmatprep.subr.bf16.mxu0 %v4725_v39  ;;  %3507 = vmatprep.subr.bf16.mxu1 %v4728_v40  ;;  %v3568_v39 = vrot.slane %v3548_v28, %v4982_v8 }
 0x3da   :  { %3426 = vmatpush1.bf16.msra.mxu0 %v4723_v41  ;;  %3508 = vmatpush1.bf16.msra.mxu1 %v4726_v42 }
 0x3db   :  { %3427 = vmatprep.subr.bf16.mxu0 %v4731_v43  ;;  %3509 = vmatprep.subr.bf16.mxu1 %v4734_v45 }
 0x3de   :  { %3428 = vmatpush1.bf16.msra.mxu0 %v4729_v46  ;;  %3510 = vmatpush1.bf16.msra.mxu1 %v4732_v47 }
 0x3df   :  { %3429 = vmatprep.subr.bf16.mxu0 %v4737_v48  ;;  %3511 = vmatprep.subr.bf16.mxu1 %v4740_v49 }
 0x3e2   :  { %3430 = vmatpush1.bf16.msra.mxu0 %v4735_v51  ;;  %3512 = vmatpush1.bf16.msra.mxu1 %v4738_v52 }
 0x3e3   :  { %3431 = vmatprep.subr.bf16.mxu0 %v4743_v54  ;;  %3513 = vmatprep.subr.bf16.mxu1 %v4746_v55 }
 0x3e6   :  { %3432 = vmatpush1.bf16.msra.mxu0 %v4741_v56  ;;  %3514 = vmatpush1.bf16.msra.mxu1 %v4744_v57 }
 0x3e7   :  { %3433 = vmatprep.subr.bf16.mxu0 %v4749_v60  ;;  %3515 = vmatprep.subr.bf16.mxu1 %v4752_v61 }
 0x3ea   :  { %3434 = vmatpush1.bf16.msra.mxu0 %v4747_v62  ;;  %3516 = vmatpush1.bf16.msra.mxu1 %v4750_v63 }
 0x3ed   :  { %3436 = vmatmul.mubr.bf16.vlgmr.msra.gmra.mrb[12].mxu0 %v2555_v1  ;;  %3518 = vmatmul.mubr.bf16.vlgmr.msra.gmra.mrb[12].mxu1 %v2555_v1 }
 0x4c0   :  { %v3437_v17 = vpop.f32.mrb[12].mxu0  ;;  %v3519_v18 = vpop.f32.mrb[12].mxu1 }
 0x4c1   :  { %v4046_v19 = vadd.f32 %v3437_v17, %v2709_v12  ;;  %v4048_v50 = vadd.f32 %v3519_v18, %v2717_v14  ;;  %v3439_v21 = vpop.f32.mrb[13].mxu0  ;;  %v3521_v27 = vpop.f32.mrb[13].mxu1 }
 0x4c2   :  { %v4047_v22 = vadd.f32 %v3439_v21, %v2713_v15  ;;  %v4049_v23 = vadd.f32 %v3521_v27, %v2721_v16  ;;  %v3441_v24 = vpop.f32.mrb[14].mxu0  ;;  %v3523_v59 = vpop.f32.mrb[14].mxu1 }
 0x4c3   :  { %v3526_v25 = vmax.f32 %v4046_v19, 0.0  ;;  %v3442_v29 = vpop.f32.mrb[15].mxu0  ;;  %v3524_v31 = vpop.f32.mrb[15].mxu1  ;;  %v3528_v32 = vmax.f32 %v4048_v50, 0.0 }
 0x4c4   :  { %v3527_v34 = vmax.f32 %v4047_v22, 0.0  ;;  %v3529_v38 = vmax.f32 %v4049_v23, 0.0 }
 0x4c5   :  { %v3569_v35 = vmul.f32 %v3556_v20, %v3526_v25  ;;  %v3571_v40 = vmul.f32 %v3564_v10, %v3528_v32 }
 0x4c6   :  { %v3570_v36 = vmul.f32 %v3560_v30, %v3527_v34  ;;  %v3572_v42 = vmul.f32 %v3568_v39, %v3529_v38 }
 0x4c8   :  { %v3573_v41 = vadd.f32 %v3570_v36, %v3569_v35 }
 0x4ca   :  { %v3574_v43 = vadd.f32 %v3573_v41, %v3571_v40 }
 0x4cc   :  { %v3575_v45 = vadd.f32 %v3574_v43, %v3572_v42 }
 0x4ce   :  { %3576 = vadd.xlane.f32.xlu0 %v3575_v45 }
 0x55b   :  { %v3577_v46 = vpop.xlane.xlu0 %3576 }
 0x55c   :  { %v3580_v47 = vadd.f32 %v3579_v26, %v3577_v46 }
 0x55e   :  { %3582 = vst.msk [vmem:[%s5074_s6] sm:$0xff] %vm3581_vm0, %v3580_v47 }
 0x55f   :  { %3587 = vsyncpa [#allocation4], 1 }
 0x560   :  { %3588 = vsyncpa [#allocation6], 1 }
 0x561   :  { %3589 = vsyncpa [#allocation9], 1 }

</bundles_post_ra>
